<compile_context>
chip_gen: v7x
topology: tpu7x:2x2x1
jax: 0.10.0
libtpu: 0.0.40
codegen_flags: <defaults>
</compile_context>

<pallas_src>
import functools
import math

import jax
import jax.numpy as jnp
from jax.experimental import pallas as pl
from jax.experimental.pallas import tpu as pltpu


def _pick_tile(dim, cap, mult):
    """Largest t <= cap with t % mult == 0 and dim % t == 0; else the full dim."""
    if dim <= cap:
        return dim
    t = (cap // mult) * mult
    while t >= mult:
        if dim % t == 0:
            return t
        t -= mult
    return dim


# ---------------------------------------------------------------------------
# Tiled linear projection:  y = x @ W (+ b), W pre-transposed to (Din, Dout) bf16.
#   grid = (T//tm, Dout//tn, Din//tk), f32 VMEM accumulator, bf16 operands on the MXU.
# ---------------------------------------------------------------------------
def _linear_kernel_bias(x_ref, w_ref, b_ref, o_ref, acc_ref):
    @pl.when(pl.program_id(2) == 0)
    def _():
        acc_ref[...] = jnp.zeros_like(acc_ref)

    acc_ref[...] += jnp.dot(x_ref[...], w_ref[...],
                            preferred_element_type=jnp.float32)

    @pl.when(pl.program_id(2) == pl.num_programs(2) - 1)
    def _():
        o_ref[...] = (acc_ref[...] + b_ref[...]).astype(o_ref.dtype)


def _linear_kernel_nobias(x_ref, w_ref, o_ref, acc_ref):
    @pl.when(pl.program_id(2) == 0)
    def _():
        acc_ref[...] = jnp.zeros_like(acc_ref)

    acc_ref[...] += jnp.dot(x_ref[...], w_ref[...],
                            preferred_element_type=jnp.float32)

    @pl.when(pl.program_id(2) == pl.num_programs(2) - 1)
    def _():
        o_ref[...] = acc_ref[...].astype(o_ref.dtype)


def linear(x, weight, bias, out_dtype=jnp.bfloat16,
           tm_cap=256, tn_cap=256, tk_cap=512):
    """x: (T, Din) bf16; weight: (Din, Dout) bf16 (pre-transposed); bias: (Dout,) f32 or None."""
    T, Din = x.shape
    Dout = weight.shape[1]
    tm = _pick_tile(T, tm_cap, 8)
    tn = _pick_tile(Dout, tn_cap, 128)
    tk = _pick_tile(Din, tk_cap, 128)
    grid = (T // tm, Dout // tn, Din // tk)

    in_specs = [
        pl.BlockSpec((tm, tk), lambda i, j, kk: (i, kk)),
        pl.BlockSpec((tk, tn), lambda i, j, kk: (kk, j)),
    ]
    args = [x, weight]
    if bias is not None:
        in_specs.append(pl.BlockSpec((1, tn), lambda i, j, kk: (0, j)))
        args.append(bias.reshape(1, Dout).astype(jnp.float32))
        kernel = _linear_kernel_bias
    else:
        kernel = _linear_kernel_nobias

    cost = pl.CostEstimate(
        flops=2 * T * Din * Dout, transcendentals=0,
        bytes_accessed=2 * (T * Din + Din * Dout + T * Dout))

    return pl.pallas_call(
        kernel,
        out_shape=jax.ShapeDtypeStruct((T, Dout), out_dtype),
        grid_spec=pltpu.PrefetchScalarGridSpec(
            num_scalar_prefetch=0, grid=grid,
            in_specs=in_specs,
            out_specs=pl.BlockSpec((tm, tn), lambda i, j, kk: (i, j)),
            scratch_shapes=[pltpu.VMEM((tm, tn), jnp.float32)]),
        compiler_params=pltpu.CompilerParams(
            dimension_semantics=("parallel", "parallel", "arbitrary")),
        cost_estimate=cost,
    )(*args)


# ---------------------------------------------------------------------------
# RoPE kernel: reads head columns straight out of the fused (T, dq+2*dkv) qkv slab
# (no head-split transpose), applies RoPE in f32, optionally folds the softmax scale,
# writes a (T, num_heads*head_dim) bf16 slab.
# ---------------------------------------------------------------------------
def _rope_kernel(x_ref, cos_ref, sin_ref, o_ref, *, scale):
    x = x_ref[...].astype(jnp.float32)            # (tb, D)
    cos = cos_ref[...]
    sin = sin_ref[...]
    half = x.shape[-1] // 2
    x1 = x[:, :half]
    x2 = x[:, half:]
    rot = jnp.concatenate([-x2, x1], axis=-1)     # rotate_half(x)
    o_ref[...] = ((x * cos + rot * sin) * scale).astype(o_ref.dtype)


def apply_rope(qkv, cos, sin, *, head_offset, num_heads, head_dim, scale,
               out_dtype=jnp.bfloat16, tb_cap=256):
    T = qkv.shape[0]
    tb = _pick_tile(T, tb_cap, 8)
    kernel = functools.partial(_rope_kernel, scale=scale)
    return pl.pallas_call(
        kernel,
        out_shape=jax.ShapeDtypeStruct((T, num_heads * head_dim), out_dtype),
        grid=(num_heads, T // tb),
        in_specs=[
            pl.BlockSpec((tb, head_dim), lambda h, i: (i, head_offset + h)),
            pl.BlockSpec((tb, head_dim), lambda h, i: (i, 0)),
            pl.BlockSpec((tb, head_dim), lambda h, i: (i, 0)),
        ],
        out_specs=pl.BlockSpec((tb, head_dim), lambda h, i: (i, h)),
        compiler_params=pltpu.CompilerParams(
            dimension_semantics=("parallel", "parallel")),
    )(qkv, cos, sin)


# ---------------------------------------------------------------------------
# Tiled varlen flash-attention (online softmax) with GQA K/V reuse and DMA-level
# segment-block skipping.
#   grid = (Hkv, nb_q, nb_k); kv axis innermost, "arbitrary".
#   Scalar-prefetched per-q-block kv ranges [kstart, kend]:
#     - compute gated with pl.when
#     - K/V/segk index_maps clamp ki into the range, so out-of-range steps dedupe to an
#       already-resident block (no HBM fetch).
#   All rep = Hq//Hkv query heads of a KV group are processed per K/V tile.
# ---------------------------------------------------------------------------
def _flash_kernel(kstart_ref, kend_ref, segq_ref, segk_ref,
                  q_ref, k_ref, v_ref, o_ref, m_sc, l_sc, acc_sc,
                  *, rep, head_dim):
    qi = pl.program_id(1)
    ki = pl.program_id(2)

    @pl.when(ki == 0)
    def _():
        m_sc[...] = jnp.full_like(m_sc, -1e30)
        l_sc[...] = jnp.zeros_like(l_sc)
        acc_sc[...] = jnp.zeros_like(acc_sc)

    @pl.when(jnp.logical_and(ki >= kstart_ref[qi], ki <= kend_ref[qi]))
    def _():
        k = k_ref[...]                                    # (tb_k, D) bf16
        v = v_ref[...]                                    # (tb_k, D) bf16
        mask = segq_ref[...] == segk_ref[...]             # (tb_q,1)==(1,tb_k) -> (tb_q,tb_k)
        for r in range(rep):                              # all q heads sharing this KV head
            q = q_ref[:, r * head_dim:(r + 1) * head_dim]  # (tb_q, D) bf16, static slice
            s = jax.lax.dot_general(q, k, (((1,), (1,)), ((), ())),
                                    preferred_element_type=jnp.float32)
            s = jnp.where(mask, s, -1e30)
            m_prev = m_sc[r]
            m_new = jnp.maximum(m_prev, jnp.max(s, axis=-1, keepdims=True))
            alpha = jnp.exp(m_prev - m_new)
            p = jnp.exp(s - m_new)
            p = jnp.where(mask, p, 0.0)                   # rows with no match yet in this tile
            l_sc[r] = alpha * l_sc[r] + jnp.sum(p, axis=-1, keepdims=True)
            acc_sc[r] = alpha * acc_sc[r] + jnp.dot(
                p.astype(v.dtype), v, preferred_element_type=jnp.float32)
            m_sc[r] = m_new

    @pl.when(ki == pl.num_programs(2) - 1)
    def _():
        for r in range(rep):
            o_ref[:, r * head_dim:(r + 1) * head_dim] = (
                acc_sc[r] / l_sc[r]).astype(o_ref.dtype)


def varlen_flash_attention(q_rope, k_rope, qkv, seg, *, num_q_heads, num_kv_heads,
                           head_dim, tq_cap=512, tk_cap=256):
    """q_rope: (T, Hq*D) bf16 (scale folded in); k_rope: (T, Hkv*D) bf16;
       qkv: fused (T, (Hq+2*Hkv)*D) bf16 slab (V read from its tail columns);
       seg: (T,) int32 nondecreasing packed-sequence ids."""
    T = q_rope.shape[0]
    rep = num_q_heads // num_kv_heads
    tb_q = _pick_tile(T, tq_cap, 8)
    tb_k = _pick_tile(T, tk_cap, 128)
    nb_q, nb_k = T // tb_q, T // tb_k

    seg = seg.astype(jnp.int32)
    # Per-block segment ranges (seg is nondecreasing in the packed layout).
    q_lo = seg[jnp.arange(nb_q) * tb_q]
    q_hi = seg[jnp.arange(nb_q) * tb_q + (tb_q - 1)]
    k_lo = seg[jnp.arange(nb_k) * tb_k]
    k_hi = seg[jnp.arange(nb_k) * tb_k + (tb_k - 1)]
    needed = (q_lo[:, None] <= k_hi[None, :]) & (k_lo[None, :] <= q_hi[:, None])
    kstart = jnp.argmax(needed, axis=1).astype(jnp.int32)
    kend = (nb_k - 1 - jnp.argmax(needed[:, ::-1], axis=1)).astype(jnp.int32)

    segq = seg.reshape(T, 1)
    segk = seg.reshape(1, T)

    def kv_blk(qi, ki, ks_ref, ke_ref):
        # Clamp into the needed range so skipped steps reuse the resident block (no DMA).
        return jnp.clip(ki, ks_ref[qi], ke_ref[qi])

    kernel = functools.partial(_flash_kernel, rep=rep, head_dim=head_dim)

    cost = pl.CostEstimate(
        flops=4 * num_q_heads * T * T * head_dim,
        transcendentals=num_q_heads * T * T,
        bytes_accessed=2 * T * head_dim * (2 * num_q_heads + 2 * num_kv_heads))

    return pl.pallas_call(
        kernel,
        out_shape=jax.ShapeDtypeStruct((T, num_q_heads * head_dim), jnp.bfloat16),
        grid_spec=pltpu.PrefetchScalarGridSpec(
            num_scalar_prefetch=2,
            grid=(num_kv_heads, nb_q, nb_k),
            in_specs=[
                pl.BlockSpec((tb_q, 1), lambda g, qi, ki, ks, ke: (qi, 0)),
                pl.BlockSpec((1, tb_k),
                             lambda g, qi, ki, ks, ke: (0, kv_blk(qi, ki, ks, ke))),
                pl.BlockSpec((tb_q, rep * head_dim),
                             lambda g, qi, ki, ks, ke: (qi, g)),
                pl.BlockSpec((tb_k, head_dim),
                             lambda g, qi, ki, ks, ke: (kv_blk(qi, ki, ks, ke), g)),
                pl.BlockSpec((tb_k, head_dim),
                             lambda g, qi, ki, ks, ke: (kv_blk(qi, ki, ks, ke),
                                                        num_q_heads + num_kv_heads + g)),
            ],
            out_specs=pl.BlockSpec((tb_q, rep * head_dim),
                                   lambda g, qi, ki, ks, ke: (qi, g)),
            scratch_shapes=[pltpu.VMEM((rep, tb_q, 1), jnp.float32),
                            pltpu.VMEM((rep, tb_q, 1), jnp.float32),
                            pltpu.VMEM((rep, tb_q, head_dim), jnp.float32)]),
        compiler_params=pltpu.CompilerParams(
            dimension_semantics=("parallel", "parallel", "arbitrary")),
        cost_estimate=cost,
    )(kstart, kend, segq, segk, q_rope, k_rope, qkv)


# ---------------------------------------------------------------------------
# Parameter packing (done once at init): fused [Wq|Wk|Wv] / Wo pre-transposed to
# (Din, Dout) and stored in bf16 so kernels DMA bf16 directly.
# ---------------------------------------------------------------------------
def prepare_params(p, num_heads, num_key_value_heads, head_dim):
    dq = num_heads * head_dim
    dkv = num_key_value_heads * head_dim
    w_qkv = jnp.concatenate([p['wq'], p['wk'], p['wv']], axis=0)     # (dq+2dkv, hidden)
    w_qkv = w_qkv.T.astype(jnp.bfloat16)                             # (hidden, dq+2dkv)
    if any(b is not None for b in (p['bq'], p['bk'], p['bv'])):
        b_qkv = jnp.concatenate([
            p['bq'] if p['bq'] is not None else jnp.zeros((dq,), jnp.float32),
            p['bk'] if p['bk'] is not None else jnp.zeros((dkv,), jnp.float32),
            p['bv'] if p['bv'] is not None else jnp.zeros((dkv,), jnp.float32),
        ], axis=0)
    else:
        b_qkv = None
    wo = p['wo'].T.astype(jnp.bfloat16)                              # (hidden, hidden)
    return dict(w_qkv=w_qkv, b_qkv=b_qkv, wo=wo, bo=p['bo'])


# ---------------------------------------------------------------------------
# SelfAttention.forward
# ---------------------------------------------------------------------------
def self_attention_forward(packed, hidden_states, pos_cos, pos_sin,
                           cu_seqlens, max_seqlen, num_heads, num_key_value_heads):
    # TODO(synk): causal / window_size kwargs and the optional kwargs['v'] (separate value
    # input) are not implemented; forward defaults (bidirectional within each sequence) used.
    del max_seqlen
    T, hidden = hidden_states.shape
    D = hidden // num_heads
    Hq, Hkv = num_heads, num_key_value_heads

    # bf16 activations + pre-packed bf16 weights into the MXU; f32 accumulate in-kernel.
    x16 = hidden_states.astype(jnp.bfloat16)
    qkv = linear(x16, packed['w_qkv'], packed['b_qkv'], out_dtype=jnp.bfloat16)

    # token -> packed-sequence (segment) id from cu_seqlens
    seg = jnp.searchsorted(cu_seqlens[1:], jnp.arange(T), side='right').astype(jnp.int32)

    # RoPE straight out of the fused qkv slab (no head-split transpose);
    # softmax scale 1/sqrt(D) folded into q here.
    # TODO(synk): flash_attn_varlen_kvpacked_func runs fp16; bf16-in / f32-accumulate here.
    sm_scale = 1.0 / math.sqrt(D)
    q_rope = apply_rope(qkv, pos_cos, pos_sin, head_offset=0,
                        num_heads=Hq, head_dim=D, scale=sm_scale)
    k_rope = apply_rope(qkv, pos_cos, pos_sin, head_offset=Hq,
                        num_heads=Hkv, head_dim=D, scale=1.0)

    # V is read directly from the qkv slab inside the attention kernel (index_map slice);
    # attention output is produced directly in (T, hidden) layout (no output transpose).
    attn = varlen_flash_attention(q_rope, k_rope, qkv, seg,
                                  num_q_heads=Hq, num_kv_heads=Hkv, head_dim=D)

    out = linear(attn, packed['wo'], packed['bo'], out_dtype=hidden_states.dtype)
    return out


# ---------------------------------------------------------------------------
# Pure-JAX f32 reference (for correctness check)
# ---------------------------------------------------------------------------
def ref_forward(params, x, cos, sin, cu_seqlens, H, n_kv):
    T, hidden = x.shape
    D = hidden // H

    def lin(a, w, b):
        y = a @ w.T
        return y + b if b is not None else y

    q = lin(x, params['wq'], params['bq']).reshape(T, H, D)
    k = lin(x, params['wk'], params['bk']).reshape(T, n_kv, D)
    v = lin(x, params['wv'], params['bv']).reshape(T, n_kv, D)

    def rope(t):
        t1, t2 = t[..., :D // 2], t[..., D // 2:]
        rot = jnp.concatenate([-t2, t1], axis=-1)
        return t * cos[:, None, :] + rot * sin[:, None, :]

    q, k = rope(q), rope(k)
    if n_kv != H:
        k = jnp.repeat(k, H // n_kv, axis=1)
        v = jnp.repeat(v, H // n_kv, axis=1)

    seg = jnp.searchsorted(cu_seqlens[1:], jnp.arange(T), side='right')
    mask = seg[:, None] == seg[None, :]
    s = jnp.einsum('thd,shd->hts', q, k) / math.sqrt(D)
    s = jnp.where(mask[None], s, -1e30)
    p = jax.nn.softmax(s, axis=-1)
    o = jnp.einsum('hts,shd->thd', p, v).reshape(T, hidden)
    return lin(o, params['wo'], params['bo'])


if __name__ == "__main__":
    key = jax.random.PRNGKey(0)
    keys = jax.random.split(key, 8)

    # config: hidden_size=512, num_attention_heads=4, num_key_value_heads=2 (GQA),
    #         q_bias=True, k_bias=False, v_bias=False, o_bias=False
    H, n_kv, D = 4, 2, 128
    hidden = H * D
    seq_lens = (96, 128, 160)          # packed varlen sequences
    T = sum(seq_lens)                  # 384 total tokens
    cu_seqlens = jnp.array([0, 96, 224, 384], jnp.int32)
    max_seqlen = max(seq_lens)

    def init(k, shape, fan_in):
        bound = 1.0 / math.sqrt(fan_in)
        return jax.random.uniform(k, shape, jnp.float32, -bound, bound)

    params = dict(
        wq=init(keys[0], (H * D, hidden), hidden),
        bq=init(keys[1], (H * D,), hidden),        # q_bias=True
        wk=init(keys[2], (n_kv * D, hidden), hidden),
        bk=None,                                   # k_bias=False
        wv=init(keys[3], (n_kv * D, hidden), hidden),
        bv=None,                                   # v_bias=False
        wo=init(keys[4], (hidden, hidden), hidden),
        bo=None,                                   # o_bias=False
    )
    packed = prepare_params(params, H, n_kv, D)

    x = jax.random.normal(keys[5], (T, hidden), jnp.float32)

    # rotary tables (positions reset at each sequence start), shape (T, head_dim)
    seg_host = jnp.searchsorted(cu_seqlens[1:], jnp.arange(T), side='right')
    pos = (jnp.arange(T) - cu_seqlens[seg_host]).astype(jnp.float32)
    inv_freq = 1.0 / (10000.0 ** (jnp.arange(0, D, 2, dtype=jnp.float32) / D))
    freqs = pos[:, None] * inv_freq[None, :]
    emb = jnp.concatenate([freqs, freqs], axis=-1)
    pos_cos, pos_sin = jnp.cos(emb), jnp.sin(emb)

    out = self_attention_forward(packed, x, pos_cos, pos_sin,
                                 cu_seqlens, max_seqlen, H, n_kv)
    out = jax.block_until_ready(out)

    ref = ref_forward(params, x, pos_cos, pos_sin, cu_seqlens, H, n_kv)
    assert out.shape == x.shape and out.dtype == x.dtype
    err = float(jnp.max(jnp.abs(out - ref)))
    # bf16 weights/activations/intermediates vs f32 reference -> relaxed tolerance
    assert jnp.allclose(out, ref, atol=4e-2, rtol=4e-2), err
    print("KERNEL_OK")
</pallas_src>

<mosaic_0001>
module attributes {stable_mosaic.version = 11 : i64} {
  func.func @_linear_kernel_bias(%arg0: i32, %arg1: i32, %arg2: i32, %arg3: memref<192x512xbf16, #tpu.memory_space<vmem>>, %arg4: memref<512x256xbf16, #tpu.memory_space<vmem>>, %arg5: memref<1x256xf32, #tpu.memory_space<vmem>>, %arg6: memref<192x256xbf16, #tpu.memory_space<vmem>>, %arg7: memref<192x256xf32, #tpu.memory_space<vmem>>) attributes {dimension_semantics = [#tpu.dimension_semantics<parallel>, #tpu.dimension_semantics<parallel>, #tpu.dimension_semantics<arbitrary>], iteration_bounds = array<i64: 2, 4, 1>, scalar_prefetch = 0 : i64, scratch_operands = 1 : i64, tpu.core_type = #tpu.core_type<tc>, window_params = [{transform_indices = @transform_0, window_bounds = array<i64: 192, 512>}, {transform_indices = @transform_1, window_bounds = array<i64: 512, 256>}, {transform_indices = @transform_2, window_bounds = array<i64: 1, 256>}, {transform_indices = @transform_3, window_bounds = array<i64: 192, 256>}]} {
    %c0_i32 = arith.constant 0 : i32
    %0 = arith.cmpi eq, %arg2, %c0_i32 : i32
    %1 = arith.extui %0 : i1 to i32
    %c0_i32_0 = arith.constant 0 : i32
    %2 = arith.cmpi ne, %1, %c0_i32_0 : i32
    scf.if %2 {
      %cst_10 = arith.constant 0.000000e+00 : f32
      %12 = vector.broadcast %cst_10 : f32 to vector<192x256xf32>
      %c0_11 = arith.constant 0 : index
      %c0_12 = arith.constant 0 : index
      %13 = vector.load %arg7[%c0_11, %c0_12] : memref<192x256xf32, #tpu.memory_space<vmem>>, vector<192x256xf32>
      tpu.vector_store %arg7[%c0_11, %c0_12], %12 {strides = array<i32>} : memref<192x256xf32, #tpu.memory_space<vmem>>, vector<192x256xf32>,
    } else {
    }
    %c0 = arith.constant 0 : index
    %c0_1 = arith.constant 0 : index
    %3 = vector.load %arg7[%c0, %c0_1] : memref<192x256xf32, #tpu.memory_space<vmem>>, vector<192x256xf32>
    %c0_2 = arith.constant 0 : index
    %c0_3 = arith.constant 0 : index
    %4 = vector.load %arg3[%c0_2, %c0_3] : memref<192x512xbf16, #tpu.memory_space<vmem>>, vector<192x512xbf16>
    %c0_4 = arith.constant 0 : index
    %c0_5 = arith.constant 0 : index
    %5 = vector.load %arg4[%c0_4, %c0_5] : memref<512x256xbf16, #tpu.memory_space<vmem>>, vector<512x256xbf16>
    %cst = arith.constant dense<0.000000e+00> : vector<192x256xf32>
    %6 = tpu.matmul %4, %5, %cst {dimension_numbers = #tpu.dot_dimension_numbers<[1], [0], [0], [1], [0, 0, 1, 1], [], []>} : vector<192x512xbf16>, vector<512x256xbf16>, vector<192x256xf32> -> vector<192x256xf32>
    %7 = arith.addf %3, %6 : vector<192x256xf32>
    %c0_6 = arith.constant 0 : index
    %c0_7 = arith.constant 0 : index
    %8 = vector.load %arg7[%c0_6, %c0_7] : memref<192x256xf32, #tpu.memory_space<vmem>>, vector<192x256xf32>
    tpu.vector_store %arg7[%c0_6, %c0_7], %7 {strides = array<i32>} : memref<192x256xf32, #tpu.memory_space<vmem>>, vector<192x256xf32>,
    %c0_i32_8 = arith.constant 0 : i32
    %9 = arith.cmpi eq, %arg2, %c0_i32_8 : i32
    %10 = arith.extui %9 : i1 to i32
    %c0_i32_9 = arith.constant 0 : i32
    %11 = arith.cmpi ne, %10, %c0_i32_9 : i32
    scf.if %11 {
      %c0_10 = arith.constant 0 : index
      %c0_11 = arith.constant 0 : index
      %12 = vector.load %arg7[%c0_10, %c0_11] : memref<192x256xf32, #tpu.memory_space<vmem>>, vector<192x256xf32>
      %c0_12 = arith.constant 0 : index
      %c0_13 = arith.constant 0 : index
      %13 = vector.load %arg5[%c0_12, %c0_13] : memref<1x256xf32, #tpu.memory_space<vmem>>, vector<1x256xf32>
      %14 = vector.broadcast %13 : vector<1x256xf32> to vector<192x256xf32>
      %15 = arith.addf %12, %14 : vector<192x256xf32>
      %16 = arith.truncf %15 : vector<192x256xf32> to vector<192x256xbf16>
      %c0_14 = arith.constant 0 : index
      %c0_15 = arith.constant 0 : index
      %17 = vector.load %arg6[%c0_14, %c0_15] : memref<192x256xbf16, #tpu.memory_space<vmem>>, vector<192x256xbf16>
      tpu.vector_store %arg6[%c0_14, %c0_15], %16 {strides = array<i32>} : memref<192x256xbf16, #tpu.memory_space<vmem>>, vector<192x256xbf16>,
    } else {
    }
    return
  }
  func.func @transform_0(%arg0: i32, %arg1: i32, %arg2: i32) -> (i32, i32) {
    %c0_i32 = arith.constant 0 : i32
    return %arg0, %arg2 : i32, i32
  }
  func.func @transform_1(%arg0: i32, %arg1: i32, %arg2: i32) -> (i32, i32) {
    %c0_i32 = arith.constant 0 : i32
    return %arg2, %arg1 : i32, i32
  }
  func.func @transform_2(%arg0: i32, %arg1: i32, %arg2: i32) -> (i32, i32) {
    %c0_i32 = arith.constant 0 : i32
    %c0_i32_0 = arith.constant 0 : i32
    return %c0_i32, %arg1 : i32, i32
  }
  func.func @transform_3(%arg0: i32, %arg1: i32, %arg2: i32) -> (i32, i32) {
    %c0_i32 = arith.constant 0 : i32
    return %arg0, %arg1 : i32, i32
  }
}

</mosaic_0001>

<bundles_post_ra>
// kernel: tpu_custom_call.1
= control target key start
LH: loop header
LB: loop body
LE: loop exit
PB: predicated region body
PF: predicated region fallthrough
CT: control target
= control target key end

     0   :  { %s3317_s0 = inlined_call_operand.hbm [shape: bf16[384,512], index: 0, kind: input, shape index: {}]   ;;  %s3318_s1 = inlined_call_operand.hbm [shape: bf16[512,1024], index: 1, kind: input, shape index: {}]   ;;  %s3319_s2 = inlined_call_operand.hbm [shape: f32[1,1024], index: 2, kind: input, shape index: {}]   ;;  %s3320_s3 = inlined_call_operand.hbm [shape: bf16[384,1024], index: 3, kind: output, shape index: {}]  }
   0x1   :  { %3335 = sst [smem:[#allocation23_spill]] %s3317_s0 }
   0x2   :  { %3336 = sst [smem:[#allocation24_spill]] %s3318_s1 }
   0x3   :  { %3337 = sst [smem:[#allocation25_spill]] %s3320_s3 }
   0x4   :  { %8 = vsyncpa [#allocation4], 0 }
   0x5   :  { %10 = vsyncpa [#allocation4 + $0x1], 0 }
   0x6   :  { %11 = vsyncpa [#allocation7], 0 }
   0x7   :  { %13 = vsyncpa [#allocation7 + $0x1], 0 }
   0x8   :  { %14 = vsyncpa [#allocation5], 0 }
   0x9   :  { %16 = vsyncpa [#allocation5 + $0x1], 0  ;;  %s2734_s12 = smov 0   ;;  %s2736_s13 = smov 0  }
   0xa   :  { %s2738_s14 = smov 0   ;;  %s2740_s15 = smov 0  }
   0xb   :  { %s2742_s16 = smov 0   ;;  %s2744_s17 = smov 0  }
   0xc   :  { %s2746_s18 = smov 0   ;;  %s2748_s19 = smov 0  }
   0xd   :  { %s2750_s20 = smov 0   ;;  %s2752_s21 = smov 0  }
   0xe   :  { %s2754_s22 = smov 0   ;;  %s2756_s23 = smov 0  }
   0xf   :  { %s2758_s24 = smov 0   ;;  %s2760_s25 = smov 0  }
  0x10 LB: > { %3338 = sst [smem:[#allocation13_spill]] %s2680_s20  ;;  %s37_s26 = sadd.s32 1, %s2692_s23  ;;  %s2700_s25 = sphi %s2760_s25, %s22_s25   ;;  %s2696_s24 = sphi %s2758_s24, %s3383_s24   ;;  %s2692_s23 = sphi %s2756_s23, %s3395_s23   ;;  %s2688_s22 = sphi %s2754_s22, %s3381_s22   ;;  %s2684_s21 = sphi %s2752_s21, %s3394_s21   ;;  %s2680_s20 = sphi %s2750_s20, %s3393_s20   ;;  %s2676_s19 = sphi %s2748_s19, %s3392_s19   ;;  %s2672_s18 = sphi %s2746_s18, %s3391_s18   ;;  %s2668_s17 = sphi %s2744_s17, %s3390_s17   ;;  %s2664_s16 = sphi %s2742_s16, %s3389_s16   ;;  %s2660_s15 = sphi %s2740_s15, %s3388_s15   ;;  %s2656_s14 = sphi %s2738_s14, %s3387_s14   ;;  %s2652_s13 = sphi %s2736_s13, %s3386_s13   ;;  %s2648_s12 = sphi %s2734_s12, %s3385_s12  }
  0x11   : > { %3339 = sst [smem:[#allocation14_spill]] %s2684_s21  ;;  %p3323_p0 = scmp.eq.s32.totalorder %s2700_s25, 0 }
  0x12   : > { %3340 = sst [smem:[#allocation15_spill]] %s2688_s22  ;;  %p2808_p1 = scmp.ge.s32.totalorder %s37_s26, 4 }
  0x13   : > { %3341 = sst [smem:[#allocation16_spill]] %s2696_s24  ;;  %p85_p2 = scmp.ne.s32.totalorder %s2668_s17, %s2664_s16 }
  0x14   : > { %p3322_p4 = scmp.lt.s32.totalorder %s2700_s25, 8  ;;  %s193_s29 = sand.u32 1, %s2700_s25  }
  0x15   : > { %p87_p5 = por %p85_p2, %p3323_p0  ;;  %s3321_s30 = sand.u32 1, %s2668_s17  }
  0x16   : > { %s1917_s4 = sshll.u32 %s3321_s30, 9  ;;  %s2069_s5 = sshll.u32 %s2692_s23, 7 }
  0x17   : > { %s3343_s1 = sld [smem:[#allocation24_spill]]  ;;  %s197_s9 = scalar_lea.vmem [#allocation6], %s1917_s4 }
  0x18   : > { %s207_s10 = sshll.u32 %s197_s9, 4  ;;  %p2832_p6 = pnand %p3322_p4, %p87_p5  ;;  %s2836_s10 = int_to_ptr.vmem [resolvable:$true] %s207_s10 }
  0x19   : > { %s2839_s30 = scalar_lea.sflag [#allocation7], %s193_s29 }
  0x1a   : > { %p3329_p9 = pneg %p2832_p6 }
  0x1d   : > { %s2828_s8 = scalar_lea.hbm %s3343_s1, %s2069_s5  ;;  %s2465_s7 = scalar_lea.hbm %s3343_s1, 32768 }
  0x1e   : > { %s2460_s5 = scalar_lea.hbm %s2828_s8, 8192  ;;  %p2466_p12 = scmp.lt.u32.totalorder %s2828_s8, %s3343_s1 }
  0x1f   : > { %p2461_p8 = scmp.ne.s32.totalorder %s2828_s8, %s2460_s5  ;;  %p2467_p13 = scmp.lt.u32.totalorder %s2465_s7, %s2460_s5 }
  0x20   : > { %p2469_p5 = scmp.lt.u32.totalorder %s2460_s5, %s2828_s8 }
  0x21   : > { %p2463_p10 = pnand %p3329_p9, %p2461_p8  ;;  %p2468_p2 = por %p2467_p13, %p2466_p12 }
  0x23   : > { %p2464_p11 = pneg %p2463_p10  ;;  %p2470_p4 = por %p2469_p5, %p2468_p2 }
  0x25   : > { %p2471_p3 = pnand %p2470_p4, %p2464_p11 }
  0x27   : > { %2474 = shalt.err (!%p2471_p3)
}
  0x28   : > { %s2475_s29 = scalar_lea.vmem %s2836_s10, 8192  ;;  %s2702_s4 = smov [#allocation6]  }
  0x29   : > { %p2476_p8 = scmp.ne.s32.totalorder %s2836_s10, %s2475_s29  ;;  %s2480_s6 = sshll.u32 %s2702_s4, 4  ;;  %s2481_s6 = int_to_ptr.vmem [resolvable:$false] %s2480_s6 }
  0x2a   : > { %s2482_s28 = scalar_lea.vmem %s2481_s6, 16384  ;;  %p2483_p7 = scmp.lt.s32.totalorder %s2836_s10, %s2481_s6 }
  0x2b   : > { %p2478_p10 = pnand %p2476_p8, %p3329_p9  ;;  %p2484_p12 = scmp.lt.s32.totalorder %s2482_s28, %s2475_s29 }
  0x2d   : > { %p2479_p0 = pneg %p2478_p10  ;;  %p2485_p13 = por %p2484_p12, %p2483_p7 }
  0x2f   : > { %p2486_p2 = pnand %p2485_p13, %p2479_p0 }
  0x31   : > { %2489 = shalt.err (!%p2486_p2)
}
  0x32   : > { %s2703_s5 = smov 512   ;;  %s2704_s7 = smov 128  }
  0x33   : > { %s2705_s9 = smov 8   ;;  %p234_p0 = scmp.lt.s32.totalorder %s2700_s25, 9 }
  0x34   : > { %2162 = dma.hbm_to_vmem [thread:$0]  (!%p2832_p6), %s2828_s8, 8192, %s2836_s10, %s2839_s30, %s2703_s5, %s2704_s7, %s2705_s9  }
  0x35   : > { %p3345_p3 = scmp.ge.s32.totalorder %s2700_s25, 1  ;;  %s2875_s4 = sadd.s32 4294967295, %s2700_s25  }
  0x36   : > { %s1912_s6 = sadd.s32 4294967294, %s2700_s25   ;;  %s3397_s26 = smov (%p2808_p1, %s37_s26), 0 }
  0x37   : > { %p2870_p4 = pnand %p3345_p3, %p234_p0  ;;  %3347 = sst [smem:[#allocation17_spill]] %s3397_s26 }
  0x38   : > { %s41_s28 = sadd.s32 1, %s2696_s24  ;;  %s50_s8 = sadd.s32 1, %s2680_s20 }
  0x39   : > { %s3346_s29 = scalar_select %p2870_p4, 1, 0 }
  0x3a   : > { %s3399_s28 = smov (!%p2808_p1, %s41_s28), %s2696_s24  ;;  %p57_p7 = scmp.ne.s32.totalorder %s2680_s20, %s2676_s19 }
  0x3b   : > { %p63_p11 = scmp.ne.s32.totalorder %s2676_s19, %s2672_s18  ;;  %p43_p5 = scmp.ge.s32.totalorder %s3399_s28, 2 }
  0x3c   : > { %p64_p8 = scmp.eq.s32.totalorder %s2875_s4, 0  ;;  %p3348_p10 = scmp.eq.s32.totalorder %s2700_s25, 0 }
  0x3d   : > { %s74_s5 = ssub.s32 %s2692_s23, %s3397_s26  ;;  %s3401_s28 = smov (%p43_p5, %s3399_s28), 0 }
  0x3e   : > { %p2896_p12 = por %p3348_p10, %p57_p7  ;;  %3350 = sst [smem:[#allocation18_spill]] %s3401_s28 }
  0x3f   : > { %p2904_p1 = por %p64_p8, %p63_p11  ;;  %p76_p13 = scmp.eq.s32.totalorder %s74_s5, 0 }
  0x40   : > { %s45_s18 = ssub.s32 %s2696_s24, %s3401_s28  ;;  %p3352_p2 = scmp.ne.s32.totalorder %s2664_s16, %s2660_s15 }
  0x41   : > { %s3351_s27 = scalar_select %p2904_p1, 1, 0 }
  0x42   : > { %p2913_p0 = por %p3352_p2, %p64_p8  ;;  %p48_p3 = scmp.eq.s32.totalorder %s45_s18, 0 }
  0x43   : > { %s129_s9 = sor.u32 %s74_s5, %s45_s18  ;;  %s3355_s1 = sadd.s32 1, %s2668_s17 }
  0x44   : > { %s3353_s7 = scalar_select %p2913_p0, 1, 0 }
  0x45   : > { %s2920_s26 = scalar_select %p76_p13, %s2668_s17, %s3355_s1  }
  0x46   : > { %3354 = sst [smem:[#allocation19_spill]] %s3353_s7  ;;  %p130_p7 = scmp.eq.s32.totalorder %s129_s9, 0 }
  0x47   : > { %3356 = sst [smem:[#allocation20_spill]] %s2920_s26  ;;  %s132_s21 = sadd.s32 1, %s2656_s14 }
  0x48   : > { %s2923_s3 = scalar_select %p48_p3, %s2680_s20, %s50_s8  }
  0x49   : > { %p142_p11 = scmp.ne.s32.totalorder %s2656_s14, %s2652_s13  ;;  %p143_p5 = scmp.eq.s32.totalorder %s2875_s4, 7 }
  0x4a   : > { %3357 = sst [smem:[#allocation21_spill]] %s2923_s3  ;;  %p148_p10 = scmp.ne.s32.totalorder %s2652_s13, %s2648_s12 }
  0x4b   : > { %s2930_s28 = scalar_select %p130_p7, %s2656_s14, %s132_s21  }
  0x4c   : > { %p2932_p8 = por %p143_p5, %p142_p11  ;;  %p149_p2 = scmp.eq.s32.totalorder %s1912_s6, 7 }
  0x4d   : > { %3358 = sst [smem:[#allocation22_spill]] %s2930_s28  ;;  %s169_s22 = sand.u32 1, %s2680_s20  }
  0x4e   : > { %s3359_s15 = scalar_select %p2932_p8, 1, 0 }
  0x4f   : > { %s2145_s7 = smul.u32 384, %s169_s22  ;;  %p2939_p9 = por %p149_p2, %p148_p10 }
  0x50   : > { %s2096_s1 = smul.u32 6144, %s2696_s24  ;;  %p3361_p13 = scmp.lt.s32.totalorder %s2700_s25, 8 }
  0x51   : > { %s3360_s5 = scalar_select %p2939_p9, 1, 0 }
  0x52   : > { %p2948_p3 = pnand %p3361_p13, %p2896_p12  ;;  %s3363_s0 = sld [smem:[#allocation23_spill]] }
  0x53   : > { %s173_s6 = scalar_lea.vmem [#allocation3], %s2145_s7  ;;  %s2959_s10 = scalar_lea.sflag [#allocation4], %s169_s22 }
  0x54   : > { %s183_s3 = sshll.u32 %s173_s6, 4  ;;  %p2492_p7 = pneg %p2948_p3  ;;  %s2957_s3 = int_to_ptr.vmem [resolvable:$true] %s183_s3 }
  0x58   : > { %s2955_s9 = scalar_lea.hbm %s3363_s0, %s2096_s1  ;;  %s2495_s18 = scalar_lea.hbm %s3363_s0, 12288 }
  0x59   : > { %s2490_s24 = scalar_lea.hbm %s2955_s9, 6144  ;;  %p2496_p10 = scmp.lt.u32.totalorder %s2955_s9, %s3363_s0 }
  0x5a   : > { %p2491_p12 = scmp.ne.s32.totalorder %s2955_s9, %s2490_s24  ;;  %p2497_p2 = scmp.lt.u32.totalorder %s2495_s18, %s2490_s24 }
  0x5b   : > { %p2499_p9 = scmp.lt.u32.totalorder %s2490_s24, %s2955_s9 }
  0x5c   : > { %p2493_p11 = pnand %p2492_p7, %p2491_p12  ;;  %p2498_p13 = por %p2497_p2, %p2496_p10 }
  0x5e   : > { %p2494_p5 = pneg %p2493_p11  ;;  %p2500_p8 = por %p2499_p9, %p2498_p13 }
  0x60   : > { %p2501_p0 = pnand %p2500_p8, %p2494_p5 }
  0x62   : > { %2504 = shalt.err (!%p2501_p0)
}
  0x63   : > { %s2505_s22 = scalar_lea.vmem %s2957_s3, 6144  ;;  %s2706_s7 = smov [#allocation3]  }
  0x64   : > { %p2506_p12 = scmp.ne.s32.totalorder %s2957_s3, %s2505_s22  ;;  %s2510_s6 = sshll.u32 %s2706_s7, 4  ;;  %s2511_s6 = int_to_ptr.vmem [resolvable:$false] %s2510_s6 }
  0x65   : > { %s2512_s20 = scalar_lea.vmem %s2511_s6, 12288  ;;  %p2513_p4 = scmp.lt.s32.totalorder %s2957_s3, %s2511_s6 }
  0x66   : > { %p2508_p11 = pnand %p2506_p12, %p2492_p7  ;;  %p2514_p10 = scmp.lt.s32.totalorder %s2512_s20, %s2505_s22 }
  0x68   : > { %p2509_p1 = pneg %p2508_p11  ;;  %p2515_p2 = por %p2514_p10, %p2513_p4 }
  0x6a   : > { %p2516_p9 = pnand %p2515_p2, %p2509_p1 }
  0x6c   : > { %2519 = shalt.err (!%p2516_p9)
}
  0x6d   : > { %s2707_s24 = smov 256   ;;  %s2708_s26 = smov 16  }
  0x6e   : > { %2159 = dma.hbm_to_vmem [thread:$0]  (!%p2948_p3), %s2955_s9, 6144, %s2957_s3, %s2959_s10, %s2707_s24, %s2707_s24, %s2708_s26  }
  0x6f   : > { %s3364_s1 = sand.u32 1, %s2668_s17   ;;  %s2070_s18 = sshll.u32 %s2692_s23, 5 }
  0x70   : > { %s1920_s21 = sshll.u32 %s3364_s1, 1  ;;  %s2993_s22 = scalar_lea.hbm %s3319_s2, %s2070_s18 }
  0x71   : > { %s221_s20 = scalar_lea.vmem [#allocation8], %s1920_s21  ;;  %s2520_s28 = scalar_lea.hbm %s2993_s22, 32 }
  0x72   : > { %s229_s0 = sshll.u32 %s221_s20, 4  ;;  %p2521_p4 = scmp.ne.s32.totalorder %s2993_s22, %s2520_s28  ;;  %s230_s0 = int_to_ptr.vmem [resolvable:$true] %s229_s0 }
  0x73   : > { %p3365_p1 = pneg %p2832_p6  ;;  %s2525_s9 = scalar_lea.hbm %s3319_s2, 128 }
  0x74   : > { %p2526_p3 = scmp.lt.u32.totalorder %s2993_s22, %s3319_s2  ;;  %p2527_p7 = scmp.lt.u32.totalorder %s2525_s9, %s2520_s28 }
  0x75   : > { %p2523_p0 = pnand %p2521_p4, %p3365_p1  ;;  %p2529_p13 = scmp.lt.u32.totalorder %s2520_s28, %s2993_s22 }
  0x76   : > { %p2528_p5 = por %p2527_p7, %p2526_p3 }
  0x77   : > { %p2524_p8 = pneg %p2523_p0 }
  0x78   : > { %p2530_p12 = por %p2529_p13, %p2528_p5 }
  0x7a   : > { %p2531_p11 = pnand %p2530_p12, %p2524_p8 }
  0x7c   : > { %2534 = shalt.err (!%p2531_p11)
}
  0x7d   : > { %s2535_s26 = scalar_lea.vmem %s230_s0, 32  ;;  %p3366_p2 = pmov %p3365_p1 }
  0x7e   : > { %p2536_p10 = scmp.ne.s32.totalorder %s230_s0, %s2535_s26  ;;  %s2709_s1 = smov [#allocation8]  }
  0x7f   : > { %s2540_s21 = sshll.u32 %s2709_s1, 4  ;;  %s2541_s21 = int_to_ptr.vmem [resolvable:$false] %s2540_s21 }
  0x80   : > { %p2538_p9 = pnand %p2536_p10, %p3366_p2  ;;  %s2542_s18 = scalar_lea.vmem %s2541_s21, 64 }
  0x81   : > { %p2543_p1 = scmp.lt.s32.totalorder %s230_s0, %s2541_s21  ;;  %p2544_p0 = scmp.lt.s32.totalorder %s2542_s18, %s2535_s26 }
  0x82   : > { %p2539_p4 = pneg %p2538_p9 }
  0x83   : > { %p2545_p3 = por %p2544_p0, %p2543_p1 }
  0x85   : > { %p2546_p7 = pnand %p2545_p3, %p2539_p4 }
  0x87   : > { %2549 = shalt.err (!%p2546_p7)
}
  0x88   : > { %2165 = dma.hbm_to_vmem [thread:$0]  (!%p2832_p6), %s2993_s22, 32, %s230_s0, %s2839_s30  }
  0x89   : > { %p3367_p8 = scmp.ne.s32.totalorder %s3346_s29, 0 }
  0x8a   : > { %s240_s28 = sand.u32 (!%p3367_p8), 1, %s2676_s19   ;;  %p3368_p5 = scmp.ne.s32.totalorder (!%p3367_p8), %s3351_s27, 0 }
  0x8b   : > { %238 = sbr.rel (%p3367_p8) target bundleno = 547 (0x223), region = 32  ;;  %s241_s6 = scalar_lea.sflag (!%p3367_p8), [#allocation4], %s240_s28 }
  0x8c   : > { %s2146_s7 = smul.u32 (!%p3367_p8), 384, %s240_s28 }
  0x8e   : > { %s3018_s20 = scalar_lea.vmem (!%p3367_p8), [#allocation3], %s2146_s7 }
  0x92   : > { %2635 = dma.done.wait (%p3368_p5), %s241_s6, 6144  }
  0x93   : > { %2637 = vsyncadd (%p3368_p5), %s241_s6, 4294961152  ;;  %s3369_s11 = sld [smem:[#allocation19_spill]]  ;;  %s249_s0 = sand.u32 1, %s2875_s4  }
  0x94   : > { %s251_s30 = sand.u32 1, %s2664_s16   ;;  %s250_s22 = scalar_lea.sflag [#allocation7], %s249_s0 }
  0x95   : > { %s1924_s29 = sshll.u32 %s251_s30, 9 }
  0x96   : > { %s3028_s3 = scalar_lea.vmem [#allocation6], %s1924_s29 }
  0x99   : > { %p3370_p6 = scmp.ne.s32.totalorder %s3369_s11, 0 }
  0x9b   : > { %2639 = dma.done.wait (%p3370_p6), %s250_s22, 8224  }
  0x9c   : > { %2641 = vsyncadd (%p3370_p6), %s250_s22, 4294959072  ;;  %v2292_v0 = vld [vmem:[%s3028_s3 + $0x4] ss:$8 sps:$4 sm:$0xff]   ;;  %v2296_v2 = vld [vmem:[%s3028_s3] ss:$8 sps:$4 sm:$0xff]   ;;  %s1925_s4 = sshll.u32 %s251_s30, 1 }
  0x9d   : > { %v2294_v1 = vld [vmem:[%s3028_s3 + $0x104] ss:$8 sps:$4 sm:$0xff]   ;;  %1074 = vmatprep.subr.bf16.mxu1 %v2292_v0  ;;  %v2297_v3 = vld [vmem:[%s3028_s3 + $0x100] ss:$8 sps:$4 sm:$0xff]   ;;  %v2298_v4 = vld [vmem:[%s3028_s3 + $0x14] ss:$8 sps:$4 sm:$0xff]  }
  0x9e   : > { %1227 = vmatprep.subr.bf16.mxu0 %v2294_v1  ;;  %1075 = vmatpush1.bf16.msra.mxu1 %v2296_v2  ;;  %v2300_v5 = vld [vmem:[%s3028_s3 + $0x114] ss:$8 sps:$4 sm:$0xff]   ;;  %v2302_v6 = vld [vmem:[%s3028_s3 + $0x10] ss:$8 sps:$4 sm:$0xff]   ;;  %v2304_v8 = vld [vmem:[%s3028_s3 + $0x24] ss:$8 sps:$4 sm:$0xff]  }
  0x9f   : > { %1228 = vmatpush1.bf16.msra.mxu0 %v2297_v3  ;;  %1076 = vmatprep.subr.bf16.mxu1 %v2298_v4  ;;  %v2303_v7 = vld [vmem:[%s3028_s3 + $0x110] ss:$8 sps:$4 sm:$0xff]   ;;  %v2306_v9 = vld [vmem:[%s3028_s3 + $0x124] ss:$8 sps:$4 sm:$0xff]   ;;  %v2308_v10 = vld [vmem:[%s3028_s3 + $0x20] ss:$8 sps:$4 sm:$0xff]  }
  0xa0   : > { %1229 = vmatprep.subr.bf16.mxu0 %v2300_v5  ;;  %v2309_v11 = vld [vmem:[%s3028_s3 + $0x120] ss:$8 sps:$4 sm:$0xff]   ;;  %v2310_v12 = vld [vmem:[%s3028_s3 + $0x34] ss:$8 sps:$4 sm:$0xff]   ;;  %v2314_v14 = vld [vmem:[%s3028_s3 + $0x30] ss:$8 sps:$4 sm:$0xff]  }
  0xa1   : > { %v2312_v13 = vld [vmem:[%s3028_s3 + $0x134] ss:$8 sps:$4 sm:$0xff]   ;;  %v2315_v15 = vld [vmem:[%s3028_s3 + $0x130] ss:$8 sps:$4 sm:$0xff]   ;;  %v2316_v16 = vld [vmem:[%s3028_s3 + $0x44] ss:$8 sps:$4 sm:$0xff]  }
  0xa2   : > { %1077 = vmatpush1.bf16.msra.mxu1 %v2302_v6  ;;  %v2318_v17 = vld [vmem:[%s3028_s3 + $0x144] ss:$8 sps:$4 sm:$0xff]   ;;  %v2320_v18 = vld [vmem:[%s3028_s3 + $0x40] ss:$8 sps:$4 sm:$0xff]   ;;  %v2322_v20 = vld [vmem:[%s3028_s3 + $0x54] ss:$8 sps:$4 sm:$0xff]  }
  0xa3   : > { %1230 = vmatpush1.bf16.msra.mxu0 %v2303_v7  ;;  %1078 = vmatprep.subr.bf16.mxu1 %v2304_v8  ;;  %v2321_v19 = vld [vmem:[%s3028_s3 + $0x140] ss:$8 sps:$4 sm:$0xff]   ;;  %v2324_v21 = vld [vmem:[%s3028_s3 + $0x154] ss:$8 sps:$4 sm:$0xff]   ;;  %v2326_v22 = vld [vmem:[%s3028_s3 + $0x50] ss:$8 sps:$4 sm:$0xff]  }
  0xa4   : > { %1231 = vmatprep.subr.bf16.mxu0 %v2306_v9  ;;  %v2327_v23 = vld [vmem:[%s3028_s3 + $0x150] ss:$8 sps:$4 sm:$0xff]   ;;  %v2328_v24 = vld [vmem:[%s3028_s3 + $0x64] ss:$8 sps:$4 sm:$0xff]   ;;  %v2332_v26 = vld [vmem:[%s3028_s3 + $0x60] ss:$8 sps:$4 sm:$0xff]  }
  0xa5   : > { %v2330_v25 = vld [vmem:[%s3028_s3 + $0x164] ss:$8 sps:$4 sm:$0xff]   ;;  %v2333_v27 = vld [vmem:[%s3028_s3 + $0x160] ss:$8 sps:$4 sm:$0xff]   ;;  %v2334_v28 = vld [vmem:[%s3028_s3 + $0x74] ss:$8 sps:$4 sm:$0xff]  }
  0xa6   : > { %1079 = vmatpush1.bf16.msra.mxu1 %v2308_v10  ;;  %v2336_v29 = vld [vmem:[%s3028_s3 + $0x174] ss:$8 sps:$4 sm:$0xff]   ;;  %v2338_v30 = vld [vmem:[%s3028_s3 + $0x70] ss:$8 sps:$4 sm:$0xff]   ;;  %v2340_v32 = vld [vmem:[%s3028_s3 + $0x84] ss:$8 sps:$4 sm:$0xff]  }
  0xa7   : > { %1232 = vmatpush1.bf16.msra.mxu0 %v2309_v11  ;;  %1080 = vmatprep.subr.bf16.mxu1 %v2310_v12  ;;  %v2339_v31 = vld [vmem:[%s3028_s3 + $0x170] ss:$8 sps:$4 sm:$0xff]   ;;  %v2342_v33 = vld [vmem:[%s3028_s3 + $0x184] ss:$8 sps:$4 sm:$0xff]   ;;  %v2344_v34 = vld [vmem:[%s3028_s3 + $0x80] ss:$8 sps:$4 sm:$0xff]  }
  0xa8   : > { %1233 = vmatprep.subr.bf16.mxu0 %v2312_v13  ;;  %v2345_v35 = vld [vmem:[%s3028_s3 + $0x180] ss:$8 sps:$4 sm:$0xff]   ;;  %v2346_v36 = vld [vmem:[%s3028_s3 + $0x94] ss:$8 sps:$4 sm:$0xff]   ;;  %v2350_v38 = vld [vmem:[%s3028_s3 + $0x90] ss:$8 sps:$4 sm:$0xff]  }
  0xa9   : > { %v2348_v37 = vld [vmem:[%s3028_s3 + $0x194] ss:$8 sps:$4 sm:$0xff]   ;;  %v2351_v39 = vld [vmem:[%s3028_s3 + $0x190] ss:$8 sps:$4 sm:$0xff]   ;;  %v2352_v40 = vld [vmem:[%s3028_s3 + $0xa4] ss:$8 sps:$4 sm:$0xff]  }
  0xaa   : > { %1081 = vmatpush1.bf16.msra.mxu1 %v2314_v14  ;;  %v2354_v41 = vld [vmem:[%s3028_s3 + $0x1a4] ss:$8 sps:$4 sm:$0xff]   ;;  %v2356_v42 = vld [vmem:[%s3028_s3 + $0xa0] ss:$8 sps:$4 sm:$0xff]   ;;  %v2358_v44 = vld [vmem:[%s3028_s3 + $0xb4] ss:$8 sps:$4 sm:$0xff]  }
  0xab   : > { %1234 = vmatpush1.bf16.msra.mxu0 %v2315_v15  ;;  %1082 = vmatprep.subr.bf16.mxu1 %v2316_v16  ;;  %v2357_v43 = vld [vmem:[%s3028_s3 + $0x1a0] ss:$8 sps:$4 sm:$0xff]   ;;  %v2360_v45 = vld [vmem:[%s3028_s3 + $0x1b4] ss:$8 sps:$4 sm:$0xff]   ;;  %v2362_v46 = vld [vmem:[%s3028_s3 + $0xb0] ss:$8 sps:$4 sm:$0xff]  }
  0xac   : > { %1235 = vmatprep.subr.bf16.mxu0 %v2318_v17  ;;  %v2363_v47 = vld [vmem:[%s3028_s3 + $0x1b0] ss:$8 sps:$4 sm:$0xff]   ;;  %v2364_v48 = vld [vmem:[%s3028_s3 + $0xc4] ss:$8 sps:$4 sm:$0xff]   ;;  %v2368_v52 = vld [vmem:[%s3028_s3 + $0xc0] ss:$8 sps:$4 sm:$0xff]  }
  0xad   : > { %v2390_v49 = vld [vmem:[%s3018_s20 + $0x4] ss:$16 sps:$4 sm:$0xff]   ;;  %v2393_v51 = vld [vmem:[%s3018_s20 + $0xc] ss:$16 sps:$4 sm:$0xff]   ;;  %v2369_v53 = vld [vmem:[%s3028_s3 + $0x1c0] ss:$8 sps:$4 sm:$0xff]  }
  0xae   : > { %1083 = vmatpush1.bf16.msra.mxu1 %v2320_v18  ;;  %v2366_v50 = vld [vmem:[%s3028_s3 + $0x1c4] ss:$8 sps:$4 sm:$0xff]   ;;  %1106 = vmatprep.mubr.bf16.mxu1 %v2390_v49  ;;  %v2370_v54 = vld [vmem:[%s3028_s3 + $0xd4] ss:$8 sps:$4 sm:$0xff]   ;;  %v2374_v56 = vld [vmem:[%s3028_s3 + $0xd0] ss:$8 sps:$4 sm:$0xff]  }
  0xaf   : > { %1236 = vmatpush1.bf16.msra.mxu0 %v2321_v19  ;;  %1084 = vmatprep.subr.bf16.mxu1 %v2322_v20  ;;  %v2372_v55 = vld [vmem:[%s3028_s3 + $0x1d4] ss:$8 sps:$4 sm:$0xff]   ;;  %v2375_v57 = vld [vmem:[%s3028_s3 + $0x1d0] ss:$8 sps:$4 sm:$0xff]   ;;  %v2376_v58 = vld [vmem:[%s3028_s3 + $0xe4] ss:$8 sps:$4 sm:$0xff]  }
  0xb0   : > { %1237 = vmatprep.subr.bf16.mxu0 %v2324_v21  ;;  %1259 = vmatprep.mubr.bf16.mxu0 %v2393_v51  ;;  %v2378_v59 = vld [vmem:[%s3028_s3 + $0x1e4] ss:$8 sps:$4 sm:$0xff]   ;;  %v2380_v60 = vld [vmem:[%s3028_s3 + $0xe0] ss:$8 sps:$4 sm:$0xff]   ;;  %v2382_v62 = vld [vmem:[%s3028_s3 + $0xf4] ss:$8 sps:$4 sm:$0xff]  }
  0xb1   : > { %v2381_v61 = vld [vmem:[%s3028_s3 + $0x1e0] ss:$8 sps:$4 sm:$0xff]   ;;  %v2384_v63 = vld [vmem:[%s3028_s3 + $0x1f4] ss:$8 sps:$4 sm:$0xff]   ;;  %v2386_v0 = vld [vmem:[%s3028_s3 + $0xf0] ss:$8 sps:$4 sm:$0xff]  }
  0xb2   : > { %1085 = vmatpush1.bf16.msra.mxu1 %v2326_v22  ;;  %v2387_v1 = vld [vmem:[%s3028_s3 + $0x1f0] ss:$8 sps:$4 sm:$0xff]   ;;  %v2394_v4 = vld [vmem:[%s3018_s20 + $0x24] ss:$16 sps:$4 sm:$0xff]   ;;  %v2396_v5 = vld [vmem:[%s3018_s20 + $0x2c] ss:$16 sps:$4 sm:$0xff]  }
  0xb3   : > { %1238 = vmatpush1.bf16.msra.mxu0 %v2327_v23  ;;  %1086 = vmatprep.subr.bf16.mxu1 %v2328_v24  ;;  %v2388_v2 = vld [vmem:[%s3018_s20] ss:$16 sps:$4 sm:$0xff]   ;;  %v2391_v3 = vld [vmem:[%s3018_s20 + $0x8] ss:$16 sps:$4 sm:$0xff]   ;;  %v2400_v8 = vld [vmem:[%s3018_s20 + $0x44] ss:$16 sps:$4 sm:$0xff]  }
  0xb4   : > { %1239 = vmatprep.subr.bf16.mxu0 %v2330_v25  ;;  %v2398_v6 = vld [vmem:[%s3018_s20 + $0x20] ss:$16 sps:$4 sm:$0xff]   ;;  %v2399_v7 = vld [vmem:[%s3018_s20 + $0x28] ss:$16 sps:$4 sm:$0xff]   ;;  %v2402_v9 = vld [vmem:[%s3018_s20 + $0x4c] ss:$16 sps:$4 sm:$0xff]  }
  0xb5   : > { %v2404_v10 = vld [vmem:[%s3018_s20 + $0x40] ss:$16 sps:$4 sm:$0xff]   ;;  %v2405_v11 = vld [vmem:[%s3018_s20 + $0x48] ss:$16 sps:$4 sm:$0xff]   ;;  %v2406_v12 = vld [vmem:[%s3018_s20 + $0x64] ss:$16 sps:$4 sm:$0xff]  }
  0xb6   : > { %1087 = vmatpush1.bf16.msra.mxu1 %v2332_v26  ;;  %v2408_v13 = vld [vmem:[%s3018_s20 + $0x6c] ss:$16 sps:$4 sm:$0xff]   ;;  %v2410_v14 = vld [vmem:[%s3018_s20 + $0x60] ss:$16 sps:$4 sm:$0xff]   ;;  %v2411_v15 = vld [vmem:[%s3018_s20 + $0x68] ss:$16 sps:$4 sm:$0xff]  }
  0xb7   : > { %1240 = vmatpush1.bf16.msra.mxu0 %v2333_v27  ;;  %1088 = vmatprep.subr.bf16.mxu1 %v2334_v28  ;;  %v2412_v16 = vld [vmem:[%s3018_s20 + $0x84] ss:$16 sps:$4 sm:$0xff]   ;;  %v2414_v17 = vld [vmem:[%s3018_s20 + $0x8c] ss:$16 sps:$4 sm:$0xff]   ;;  %v2416_v18 = vld [vmem:[%s3018_s20 + $0x80] ss:$16 sps:$4 sm:$0xff]  }
  0xb8   : > { %1241 = vmatprep.subr.bf16.mxu0 %v2336_v29  ;;  %v2417_v19 = vld [vmem:[%s3018_s20 + $0x88] ss:$16 sps:$4 sm:$0xff]   ;;  %v2418_v20 = vld [vmem:[%s3018_s20 + $0xa4] ss:$16 sps:$4 sm:$0xff]   ;;  %v2420_v21 = vld [vmem:[%s3018_s20 + $0xac] ss:$16 sps:$4 sm:$0xff]  }
  0xb9   : > { %v2422_v22 = vld [vmem:[%s3018_s20 + $0xa0] ss:$16 sps:$4 sm:$0xff]   ;;  %v2423_v23 = vld [vmem:[%s3018_s20 + $0xa8] ss:$16 sps:$4 sm:$0xff]   ;;  %v2424_v24 = vld [vmem:[%s3018_s20 + $0xc4] ss:$16 sps:$4 sm:$0xff]  }
  0xba   : > { %1089 = vmatpush1.bf16.msra.mxu1 %v2338_v30  ;;  %v2426_v25 = vld [vmem:[%s3018_s20 + $0xcc] ss:$16 sps:$4 sm:$0xff]   ;;  %v2428_v26 = vld [vmem:[%s3018_s20 + $0xc0] ss:$16 sps:$4 sm:$0xff]   ;;  %v2429_v27 = vld [vmem:[%s3018_s20 + $0xc8] ss:$16 sps:$4 sm:$0xff]  }
  0xbb   : > { %1242 = vmatpush1.bf16.msra.mxu0 %v2339_v31  ;;  %1090 = vmatprep.subr.bf16.mxu1 %v2340_v32  ;;  %v2430_v28 = vld [vmem:[%s3018_s20 + $0xe4] ss:$16 sps:$4 sm:$0xff]   ;;  %v2432_v29 = vld [vmem:[%s3018_s20 + $0xec] ss:$16 sps:$4 sm:$0xff]   ;;  %v2434_v30 = vld [vmem:[%s3018_s20 + $0xe0] ss:$16 sps:$4 sm:$0xff]  }
  0xbc   : > { %1243 = vmatprep.subr.bf16.mxu0 %v2342_v33  ;;  %v2435_v31 = vld [vmem:[%s3018_s20 + $0xe8] ss:$16 sps:$4 sm:$0xff]   ;;  %v2436_v32 = vld [vmem:[%s3018_s20 + $0x104] ss:$16 sps:$4 sm:$0xff]   ;;  %v2438_v33 = vld [vmem:[%s3018_s20 + $0x10c] ss:$16 sps:$4 sm:$0xff]  }
  0xbd   : > { %s262_s27 = scalar_lea.vmem [#allocation8], %s1925_s4  ;;  %s292_s8 = sand.u32 1, %s2652_s13  }
  0xbe   : > { %1091 = vmatpush1.bf16.msra.mxu1 %v2344_v34  ;;  %v2440_v34 = vld [vmem:[%s3018_s20 + $0x100] ss:$16 sps:$4 sm:$0xff]   ;;  %s2147_s9 = smul.u32 192, %s292_s8  ;;  %s3371_s24 = sld [smem:[#allocation15_spill]] }
  0xbf   : > { %1244 = vmatpush1.bf16.msra.mxu0 %v2345_v35  ;;  %1092 = vmatprep.subr.bf16.mxu1 %v2346_v36  ;;  %v2441_v35 = vld [vmem:[%s3018_s20 + $0x108] ss:$16 sps:$4 sm:$0xff]   ;;  %v2442_v36 = vld [vmem:[%s3018_s20 + $0x124] ss:$16 sps:$4 sm:$0xff]   ;;  %v1527_v51 = vld [vmem:[%s262_s27] sm:$0x3] }
  0xc0   : > { %1245 = vmatprep.subr.bf16.mxu0 %v2348_v37  ;;  %v2444_v37 = vld [vmem:[%s3018_s20 + $0x12c] ss:$16 sps:$4 sm:$0xff]   ;;  %s3159_s10 = scalar_lea.vmem [#allocation9], %s2147_s9  ;;  %s3372_s26 = sld [smem:[#allocation14_spill]] }
  0xc1   : > { %s1772_s7 = sshll.u32 %s3159_s10, 4  ;;  %s3373_s11 = sld [smem:[#allocation25_spill]]  ;;  %s3235_s7 = int_to_ptr.vmem [resolvable:$true] %s1772_s7 }
  0xc2   : > { %1093 = vmatpush1.bf16.msra.mxu1 %v2350_v38  ;;  %v2446_v38 = vld [vmem:[%s3018_s20 + $0x120] ss:$16 sps:$4 sm:$0xff]   ;;  %s3241_s30 = scalar_lea.sflag [#allocation5], %s292_s8  ;;  %s2550_s29 = scalar_lea.vmem %s3235_s7, 3072 }
  0xc3   : > { %1246 = vmatpush1.bf16.msra.mxu0 %v2351_v39  ;;  %1094 = vmatprep.subr.bf16.mxu1 %v2352_v40  ;;  %v2447_v39 = vld [vmem:[%s3018_s20 + $0x128] ss:$16 sps:$4 sm:$0xff]   ;;  %v2448_v40 = vld [vmem:[%s3018_s20 + $0x144] ss:$16 sps:$4 sm:$0xff]   ;;  %p2551_p13 = scmp.ne.s32.totalorder %s3235_s7, %s2550_s29  ;;  %p3374_p12 = scmp.ne.s32.totalorder %s3359_s15, 0 }
  0xc4   : > { %1247 = vmatprep.subr.bf16.mxu0 %v2354_v41  ;;  %v2450_v41 = vld [vmem:[%s3018_s20 + $0x14c] ss:$16 sps:$4 sm:$0xff]   ;;  %s2095_s1 = smul.u32 192, %s3371_s24  ;;  %s2710_s22 = smov [#allocation9]  }
  0xc5   : > { %p2552_p11 = pnand %p2551_p13, %p3374_p12  ;;  %s2554_s3 = sshll.u32 %s2710_s22, 4  ;;  %s2555_s3 = int_to_ptr.vmem [resolvable:$false] %s2554_s3 }
  0xc6   : > { %1095 = vmatpush1.bf16.msra.mxu1 %v2356_v42  ;;  %v2452_v42 = vld [vmem:[%s3018_s20 + $0x140] ss:$16 sps:$4 sm:$0xff]   ;;  %s2062_s21 = sshll.u32 %s3372_s26, 1  ;;  %s2556_s4 = scalar_lea.vmem %s2555_s3, 6144 }
  0xc7   : > { %1248 = vmatpush1.bf16.msra.mxu0 %v2357_v43  ;;  %1096 = vmatprep.subr.bf16.mxu1 %v2358_v44  ;;  %v2453_v43 = vld [vmem:[%s3018_s20 + $0x148] ss:$16 sps:$4 sm:$0xff]   ;;  %v2454_v44 = vld [vmem:[%s3018_s20 + $0x164] ss:$16 sps:$4 sm:$0xff]   ;;  %s1769_s18 = sadd.s32 %s2095_s1, %s2062_s21  ;;  %p2553_p10 = pneg %p2552_p11 }
  0xc8   : > { %1249 = vmatprep.subr.bf16.mxu0 %v2360_v45  ;;  %v2456_v45 = vld [vmem:[%s3018_s20 + $0x16c] ss:$16 sps:$4 sm:$0xff]   ;;  %s2064_s28 = sshll.u32 %s1769_s18, 6  ;;  %p2557_p2 = scmp.lt.s32.totalorder %s3235_s7, %s2555_s3 }
  0xc9   : > { %s3233_s0 = scalar_lea.hbm %s3373_s11, %s2064_s28  ;;  %p2558_p9 = scmp.lt.s32.totalorder %s2556_s4, %s2550_s29 }
  0xca   : > { %1097 = vmatpush1.bf16.msra.mxu1 %v2362_v46  ;;  %v2458_v46 = vld [vmem:[%s3018_s20 + $0x160] ss:$16 sps:$4 sm:$0xff]  }
  0xcb   : > { %1250 = vmatpush1.bf16.msra.mxu0 %v2363_v47  ;;  %1098 = vmatprep.subr.bf16.mxu1 %v2364_v48  ;;  %v2459_v47 = vld [vmem:[%s3018_s20 + $0x168] ss:$16 sps:$4 sm:$0xff]   ;;  %v1529_v48 = vlaneseq  ;;  %p2559_p4 = por %p2558_p9, %p2557_p2 }
  0xcc   : > { %1251 = vmatprep.subr.bf16.mxu0 %v2366_v50 }
  0xcd   : > { %v1530_v49 = vshrl.u32 %v1529_v48, 7  ;;  %p2560_p1 = pnand %p2559_p4, %p2553_p10 }
  0xce   : > { %1099 = vmatpush1.bf16.msra.mxu1 %v2368_v52 }
  0xcf   : > { %1252 = vmatpush1.bf16.msra.mxu0 %v2369_v53  ;;  %1100 = vmatprep.subr.bf16.mxu1 %v2370_v54  ;;  %v1531_v50 = vsub.s32 0, %v1530_v49  ;;  %v1535_v52 = vsub.s32 1, %v1530_v49 }
  0xd0   : > { %1253 = vmatprep.subr.bf16.mxu0 %v2372_v55 }
  0xd1   : > { %v3149_v53 = vrot.slane %v1527_v51, %v1531_v50 }
  0xd2   : > { %1101 = vmatpush1.bf16.msra.mxu1 %v2374_v56  ;;  %v3151_v56 = vrot.slane %v1527_v51, %v1535_v52 }
  0xd3   : > { %1254 = vmatpush1.bf16.msra.mxu0 %v2375_v57  ;;  %1102 = vmatprep.subr.bf16.mxu1 %v2376_v58 }
  0xd4   : > { %1255 = vmatprep.subr.bf16.mxu0 %v2378_v59 }
  0xd6   : > { %1103 = vmatpush1.bf16.msra.mxu1 %v2380_v60 }
  0xd7   : > { %1256 = vmatpush1.bf16.msra.mxu0 %v2381_v61  ;;  %1104 = vmatprep.subr.bf16.mxu1 %v2382_v62 }
  0xd8   : > { %1257 = vmatprep.subr.bf16.mxu0 %v2384_v63 }
  0xda   : > { %1105 = vmatpush1.bf16.msra.mxu1 %v2386_v0 }
  0xdb   : > { %1258 = vmatpush1.bf16.msra.mxu0 %v2387_v1 }
  0xdd   : > { %1107 = vmatmul.mubr.bf16.vlgmr.msra.gmra.mrb[0].mxu1 %v2388_v2 }
  0xde   : > { %1260 = vmatmul.mubr.bf16.vlgmr.msra.gmra.mrb[0].mxu0 %v2391_v3  ;;  %1116 = vmatprep.mubr.bf16.mxu1 %v2394_v4 }
  0xdf   : > { %1269 = vmatprep.mubr.bf16.mxu0 %v2396_v5 }
  0xe5   : > { %1117 = vmatmul.mubr.bf16.gmra.mrb[4].mxu1 %v2398_v6 }
  0xe6   : > { %1270 = vmatmul.mubr.bf16.gmra.mrb[4].mxu0 %v2399_v7  ;;  %1126 = vmatprep.mubr.bf16.mxu1 %v2400_v8 }
  0xe7   : > { %1279 = vmatprep.mubr.bf16.mxu0 %v2402_v9 }
  0xed   : > { %1127 = vmatmul.mubr.bf16.gmra.mrb[8].mxu1 %v2404_v10 }
  0xee   : > { %1280 = vmatmul.mubr.bf16.gmra.mrb[8].mxu0 %v2405_v11  ;;  %1136 = vmatprep.mubr.bf16.mxu1 %v2406_v12 }
  0xef   : > { %1289 = vmatprep.mubr.bf16.mxu0 %v2408_v13 }
  0xf5   : > { %1137 = vmatmul.mubr.bf16.gmra.mrb[12].mxu1 %v2410_v14 }
  0xf6   : > { %1290 = vmatmul.mubr.bf16.gmra.mrb[12].mxu0 %v2411_v15  ;;  %1146 = vmatprep.mubr.bf16.mxu1 %v2412_v16 }
  0xf7   : > { %1299 = vmatprep.mubr.bf16.mxu0 %v2414_v17 }
  0xfd   : > { %1147 = vmatmul.mubr.bf16.gmra.mrb[16].mxu1 %v2416_v18 }
  0xfe   : > { %1300 = vmatmul.mubr.bf16.gmra.mrb[16].mxu0 %v2417_v19  ;;  %1156 = vmatprep.mubr.bf16.mxu1 %v2418_v20 }
  0xff   : > { %1309 = vmatprep.mubr.bf16.mxu0 %v2420_v21 }
 0x105   : > { %1157 = vmatmul.mubr.bf16.gmra.mrb[20].mxu1 %v2422_v22 }
 0x106   : > { %1310 = vmatmul.mubr.bf16.gmra.mrb[20].mxu0 %v2423_v23  ;;  %1166 = vmatprep.mubr.bf16.mxu1 %v2424_v24 }
 0x107   : > { %1319 = vmatprep.mubr.bf16.mxu0 %v2426_v25 }
 0x10d   : > { %1167 = vmatmul.mubr.bf16.gmra.mrb[24].mxu1 %v2428_v26 }
 0x10e   : > { %1320 = vmatmul.mubr.bf16.gmra.mrb[24].mxu0 %v2429_v27  ;;  %1176 = vmatprep.mubr.bf16.mxu1 %v2430_v28 }
 0x10f   : > { %1329 = vmatprep.mubr.bf16.mxu0 %v2432_v29 }
 0x115   : > { %1177 = vmatmul.mubr.bf16.gmra.mrb[28].mxu1 %v2434_v30 }
 0x116   : > { %1330 = vmatmul.mubr.bf16.gmra.mrb[28].mxu0 %v2435_v31  ;;  %1186 = vmatprep.mubr.bf16.mxu1 %v2436_v32 }
 0x117   : > { %1339 = vmatprep.mubr.bf16.mxu0 %v2438_v33 }
 0x11d   : > { %1187 = vmatmul.mubr.bf16.gmra.mrb[32].mxu1 %v2440_v34 }
 0x11e   : > { %1340 = vmatmul.mubr.bf16.gmra.mrb[32].mxu0 %v2441_v35  ;;  %1196 = vmatprep.mubr.bf16.mxu1 %v2442_v36 }
 0x11f   : > { %1349 = vmatprep.mubr.bf16.mxu0 %v2444_v37 }
 0x125   : > { %1197 = vmatmul.mubr.bf16.gmra.mrb[36].mxu1 %v2446_v38 }
 0x126   : > { %1350 = vmatmul.mubr.bf16.gmra.mrb[36].mxu0 %v2447_v39  ;;  %1206 = vmatprep.mubr.bf16.mxu1 %v2448_v40 }
 0x127   : > { %1359 = vmatprep.mubr.bf16.mxu0 %v2450_v41 }
 0x12d   : > { %1207 = vmatmul.mubr.bf16.gmra.mrb[40].mxu1 %v2452_v42 }
 0x12e   : > { %1360 = vmatmul.mubr.bf16.gmra.mrb[40].mxu0 %v2453_v43  ;;  %1216 = vmatprep.mubr.bf16.mxu1 %v2454_v44 }
 0x12f   : > { %1369 = vmatprep.mubr.bf16.mxu0 %v2456_v45 }
 0x135   : > { %1217 = vmatmul.mubr.bf16.gmra.mrb[44].mxu1 %v2458_v46 }
 0x136   : > { %1370 = vmatmul.mubr.bf16.gmra.mrb[44].mxu0 %v2459_v47 }
 0x1b0   : > { %v1108_v54 = vpop.f32.mrb[0].mxu1 }
 0x1b1   : > { %v1261_v55 = vpop.f32.mrb[0].mxu0  ;;  %v1110_v58 = vpop.f32.mrb[1].mxu1 }
 0x1b2   : > { %v1262_v57 = vadd.f32 %v1261_v55, %v1108_v54  ;;  %v1263_v59 = vpop.f32.mrb[1].mxu0  ;;  %v1112_v61 = vpop.f32.mrb[2].mxu1 }
 0x1b3   : > { %v1264_v60 = vadd.f32 %v1263_v59, %v1110_v58  ;;  %v1265_v62 = vpop.f32.mrb[2].mxu0  ;;  %v1114_v1 = vpop.f32.mrb[3].mxu1 }
 0x1b4   : > { %v1539_v63 = vadd.f32 %v3149_v53, %v1262_v57  ;;  %v1266_v0 = vadd.f32 %v1265_v62, %v1112_v61  ;;  %v1267_v2 = vpop.f32.mrb[3].mxu0 }
 0x1b5   : > { %v1540_v3 = vadd.f32 %v3151_v56, %v1264_v60  ;;  %v1268_v4 = vadd.f32 %v1267_v2, %v1114_v1 }
 0x1b6   : > { %v1541_v5 = vadd.f32 %v3149_v53, %v1266_v0 }
 0x1b7   : > { %v2071_v6 = vpack.c.bf16 %v1540_v3, %v1539_v63  ;;  %v1542_v7 = vadd.f32 %v3151_v56, %v1268_v4 }
 0x1b8   : > { %v1118_v9 = vpop.f32.mrb[4].mxu1 }
 0x1b9   : > { %1731 = vst [vmem:[%s3159_s10] sm:$0xff] %v2071_v6  ;;  %v2072_v8 = vpack.c.bf16 %v1542_v7, %v1541_v5  ;;  %v1271_v10 = vpop.f32.mrb[4].mxu0  ;;  %v1120_v12 = vpop.f32.mrb[5].mxu1 }
 0x1ba   : > { %v1272_v11 = vadd.f32 %v1271_v10, %v1118_v9  ;;  %v1273_v13 = vpop.f32.mrb[5].mxu0  ;;  %v1122_v15 = vpop.f32.mrb[6].mxu1 }
 0x1bb   : > { %1732 = vst [vmem:[%s3159_s10 + $0x8] sm:$0xff] %v2072_v8  ;;  %v1274_v14 = vadd.f32 %v1273_v13, %v1120_v12  ;;  %v1275_v16 = vpop.f32.mrb[6].mxu0  ;;  %v1124_v19 = vpop.f32.mrb[7].mxu1 }
 0x1bc   : > { %v1543_v17 = vadd.f32 %v3149_v53, %v1272_v11  ;;  %v1276_v18 = vadd.f32 %v1275_v16, %v1122_v15  ;;  %v1277_v20 = vpop.f32.mrb[7].mxu0 }
 0x1bd   : > { %v1544_v21 = vadd.f32 %v3151_v56, %v1274_v14  ;;  %v1278_v22 = vadd.f32 %v1277_v20, %v1124_v19 }
 0x1be   : > { %v1545_v23 = vadd.f32 %v3149_v53, %v1276_v18 }
 0x1bf   : > { %v2073_v24 = vpack.c.bf16 %v1544_v21, %v1543_v17  ;;  %v1546_v25 = vadd.f32 %v3151_v56, %v1278_v22 }
 0x1c0   : > { %v1128_v27 = vpop.f32.mrb[8].mxu1 }
 0x1c1   : > { %1733 = vst [vmem:[%s3159_s10 + $0x10] sm:$0xff] %v2073_v24  ;;  %v2074_v26 = vpack.c.bf16 %v1546_v25, %v1545_v23  ;;  %v1281_v28 = vpop.f32.mrb[8].mxu0  ;;  %v1130_v30 = vpop.f32.mrb[9].mxu1 }
 0x1c2   : > { %v1282_v29 = vadd.f32 %v1281_v28, %v1128_v27  ;;  %v1283_v31 = vpop.f32.mrb[9].mxu0  ;;  %v1132_v33 = vpop.f32.mrb[10].mxu1 }
 0x1c3   : > { %1734 = vst [vmem:[%s3159_s10 + $0x18] sm:$0xff] %v2074_v26  ;;  %v1284_v32 = vadd.f32 %v1283_v31, %v1130_v30  ;;  %v1285_v34 = vpop.f32.mrb[10].mxu0  ;;  %v1134_v37 = vpop.f32.mrb[11].mxu1 }
 0x1c4   : > { %v1547_v35 = vadd.f32 %v3149_v53, %v1282_v29  ;;  %v1286_v36 = vadd.f32 %v1285_v34, %v1132_v33  ;;  %v1287_v38 = vpop.f32.mrb[11].mxu0 }
 0x1c5   : > { %v1548_v39 = vadd.f32 %v3151_v56, %v1284_v32  ;;  %v1288_v40 = vadd.f32 %v1287_v38, %v1134_v37 }
 0x1c6   : > { %v1549_v41 = vadd.f32 %v3149_v53, %v1286_v36 }
 0x1c7   : > { %v2075_v42 = vpack.c.bf16 %v1548_v39, %v1547_v35  ;;  %v1550_v43 = vadd.f32 %v3151_v56, %v1288_v40 }
 0x1c8   : > { %v1138_v45 = vpop.f32.mrb[12].mxu1 }
 0x1c9   : > { %1735 = vst [vmem:[%s3159_s10 + $0x20] sm:$0xff] %v2075_v42  ;;  %v2076_v44 = vpack.c.bf16 %v1550_v43, %v1549_v41  ;;  %v1291_v46 = vpop.f32.mrb[12].mxu0  ;;  %v1140_v48 = vpop.f32.mrb[13].mxu1 }
 0x1ca   : > { %v1292_v47 = vadd.f32 %v1291_v46, %v1138_v45  ;;  %v1293_v49 = vpop.f32.mrb[13].mxu0  ;;  %v1142_v51 = vpop.f32.mrb[14].mxu1 }
 0x1cb   : > { %1736 = vst [vmem:[%s3159_s10 + $0x28] sm:$0xff] %v2076_v44  ;;  %v1294_v50 = vadd.f32 %v1293_v49, %v1140_v48  ;;  %v1295_v52 = vpop.f32.mrb[14].mxu0  ;;  %v1144_v57 = vpop.f32.mrb[15].mxu1 }
 0x1cc   : > { %v1551_v54 = vadd.f32 %v3149_v53, %v1292_v47  ;;  %v1296_v55 = vadd.f32 %v1295_v52, %v1142_v51  ;;  %v1297_v58 = vpop.f32.mrb[15].mxu0 }
 0x1cd   : > { %v1552_v59 = vadd.f32 %v3151_v56, %v1294_v50  ;;  %v1298_v60 = vadd.f32 %v1297_v58, %v1144_v57 }
 0x1ce   : > { %v1553_v61 = vadd.f32 %v3149_v53, %v1296_v55 }
 0x1cf   : > { %v2077_v62 = vpack.c.bf16 %v1552_v59, %v1551_v54  ;;  %v1554_v63 = vadd.f32 %v3151_v56, %v1298_v60 }
 0x1d0   : > { %v1148_v1 = vpop.f32.mrb[16].mxu1 }
 0x1d1   : > { %1737 = vst [vmem:[%s3159_s10 + $0x30] sm:$0xff] %v2077_v62  ;;  %v2078_v0 = vpack.c.bf16 %v1554_v63, %v1553_v61  ;;  %v1301_v2 = vpop.f32.mrb[16].mxu0  ;;  %v1150_v4 = vpop.f32.mrb[17].mxu1 }
 0x1d2   : > { %v1302_v3 = vadd.f32 %v1301_v2, %v1148_v1  ;;  %v1303_v5 = vpop.f32.mrb[17].mxu0  ;;  %v1152_v7 = vpop.f32.mrb[18].mxu1 }
 0x1d3   : > { %1738 = vst [vmem:[%s3159_s10 + $0x38] sm:$0xff] %v2078_v0  ;;  %v1304_v6 = vadd.f32 %v1303_v5, %v1150_v4  ;;  %v1305_v8 = vpop.f32.mrb[18].mxu0  ;;  %v1154_v11 = vpop.f32.mrb[19].mxu1 }
 0x1d4   : > { %v1555_v9 = vadd.f32 %v3149_v53, %v1302_v3  ;;  %v1306_v10 = vadd.f32 %v1305_v8, %v1152_v7  ;;  %v1307_v12 = vpop.f32.mrb[19].mxu0 }
 0x1d5   : > { %v1556_v13 = vadd.f32 %v3151_v56, %v1304_v6  ;;  %v1308_v14 = vadd.f32 %v1307_v12, %v1154_v11 }
 0x1d6   : > { %v1557_v15 = vadd.f32 %v3149_v53, %v1306_v10 }
 0x1d7   : > { %v2079_v16 = vpack.c.bf16 %v1556_v13, %v1555_v9  ;;  %v1558_v17 = vadd.f32 %v3151_v56, %v1308_v14 }
 0x1d8   : > { %v1158_v19 = vpop.f32.mrb[20].mxu1 }
 0x1d9   : > { %1739 = vst [vmem:[%s3159_s10 + $0x40] sm:$0xff] %v2079_v16  ;;  %v2080_v18 = vpack.c.bf16 %v1558_v17, %v1557_v15  ;;  %v1311_v20 = vpop.f32.mrb[20].mxu0  ;;  %v1160_v22 = vpop.f32.mrb[21].mxu1 }
 0x1da   : > { %v1312_v21 = vadd.f32 %v1311_v20, %v1158_v19  ;;  %v1313_v23 = vpop.f32.mrb[21].mxu0  ;;  %v1162_v25 = vpop.f32.mrb[22].mxu1 }
 0x1db   : > { %1740 = vst [vmem:[%s3159_s10 + $0x48] sm:$0xff] %v2080_v18  ;;  %v1314_v24 = vadd.f32 %v1313_v23, %v1160_v22  ;;  %v1315_v26 = vpop.f32.mrb[22].mxu0  ;;  %v1164_v29 = vpop.f32.mrb[23].mxu1 }
 0x1dc   : > { %v1559_v27 = vadd.f32 %v3149_v53, %v1312_v21  ;;  %v1316_v28 = vadd.f32 %v1315_v26, %v1162_v25  ;;  %v1317_v30 = vpop.f32.mrb[23].mxu0 }
 0x1dd   : > { %v1560_v31 = vadd.f32 %v3151_v56, %v1314_v24  ;;  %v1318_v32 = vadd.f32 %v1317_v30, %v1164_v29 }
 0x1de   : > { %v1561_v33 = vadd.f32 %v3149_v53, %v1316_v28 }
 0x1df   : > { %v2081_v34 = vpack.c.bf16 %v1560_v31, %v1559_v27  ;;  %v1562_v35 = vadd.f32 %v3151_v56, %v1318_v32 }
 0x1e0   : > { %v1168_v37 = vpop.f32.mrb[24].mxu1 }
 0x1e1   : > { %1741 = vst [vmem:[%s3159_s10 + $0x50] sm:$0xff] %v2081_v34  ;;  %v2082_v36 = vpack.c.bf16 %v1562_v35, %v1561_v33  ;;  %v1321_v38 = vpop.f32.mrb[24].mxu0  ;;  %v1170_v40 = vpop.f32.mrb[25].mxu1 }
 0x1e2   : > { %v1322_v39 = vadd.f32 %v1321_v38, %v1168_v37  ;;  %v1323_v41 = vpop.f32.mrb[25].mxu0  ;;  %v1172_v43 = vpop.f32.mrb[26].mxu1 }
 0x1e3   : > { %1742 = vst [vmem:[%s3159_s10 + $0x58] sm:$0xff] %v2082_v36  ;;  %v1324_v42 = vadd.f32 %v1323_v41, %v1170_v40  ;;  %v1325_v44 = vpop.f32.mrb[26].mxu0  ;;  %v1174_v47 = vpop.f32.mrb[27].mxu1 }
 0x1e4   : > { %v1563_v45 = vadd.f32 %v3149_v53, %v1322_v39  ;;  %v1326_v46 = vadd.f32 %v1325_v44, %v1172_v43  ;;  %v1327_v48 = vpop.f32.mrb[27].mxu0 }
 0x1e5   : > { %v1564_v49 = vadd.f32 %v3151_v56, %v1324_v42  ;;  %v1328_v50 = vadd.f32 %v1327_v48, %v1174_v47 }
 0x1e6   : > { %v1565_v51 = vadd.f32 %v3149_v53, %v1326_v46 }
 0x1e7   : > { %v2083_v52 = vpack.c.bf16 %v1564_v49, %v1563_v45  ;;  %v1566_v54 = vadd.f32 %v3151_v56, %v1328_v50 }
 0x1e8   : > { %v1178_v57 = vpop.f32.mrb[28].mxu1 }
 0x1e9   : > { %1743 = vst [vmem:[%s3159_s10 + $0x60] sm:$0xff] %v2083_v52  ;;  %v2084_v55 = vpack.c.bf16 %v1566_v54, %v1565_v51  ;;  %v1331_v58 = vpop.f32.mrb[28].mxu0  ;;  %v1180_v60 = vpop.f32.mrb[29].mxu1 }
 0x1ea   : > { %v1332_v59 = vadd.f32 %v1331_v58, %v1178_v57  ;;  %v1333_v61 = vpop.f32.mrb[29].mxu0  ;;  %v1182_v63 = vpop.f32.mrb[30].mxu1 }
 0x1eb   : > { %1744 = vst [vmem:[%s3159_s10 + $0x68] sm:$0xff] %v2084_v55  ;;  %v1334_v62 = vadd.f32 %v1333_v61, %v1180_v60  ;;  %v1335_v0 = vpop.f32.mrb[30].mxu0  ;;  %v1184_v3 = vpop.f32.mrb[31].mxu1 }
 0x1ec   : > { %v1567_v1 = vadd.f32 %v3149_v53, %v1332_v59  ;;  %v1336_v2 = vadd.f32 %v1335_v0, %v1182_v63  ;;  %v1337_v4 = vpop.f32.mrb[31].mxu0 }
 0x1ed   : > { %v1568_v5 = vadd.f32 %v3151_v56, %v1334_v62  ;;  %v1338_v6 = vadd.f32 %v1337_v4, %v1184_v3 }
 0x1ee   : > { %v1569_v7 = vadd.f32 %v3149_v53, %v1336_v2 }
 0x1ef   : > { %v2085_v8 = vpack.c.bf16 %v1568_v5, %v1567_v1  ;;  %v1570_v9 = vadd.f32 %v3151_v56, %v1338_v6 }
 0x1f0   : > { %v1188_v11 = vpop.f32.mrb[32].mxu1 }
 0x1f1   : > { %1745 = vst [vmem:[%s3159_s10 + $0x70] sm:$0xff] %v2085_v8  ;;  %v2086_v10 = vpack.c.bf16 %v1570_v9, %v1569_v7  ;;  %v1341_v12 = vpop.f32.mrb[32].mxu0  ;;  %v1190_v14 = vpop.f32.mrb[33].mxu1 }
 0x1f2   : > { %v1342_v13 = vadd.f32 %v1341_v12, %v1188_v11  ;;  %v1343_v15 = vpop.f32.mrb[33].mxu0  ;;  %v1192_v17 = vpop.f32.mrb[34].mxu1 }
 0x1f3   : > { %1746 = vst [vmem:[%s3159_s10 + $0x78] sm:$0xff] %v2086_v10  ;;  %v1344_v16 = vadd.f32 %v1343_v15, %v1190_v14  ;;  %v1345_v18 = vpop.f32.mrb[34].mxu0  ;;  %v1194_v21 = vpop.f32.mrb[35].mxu1 }
 0x1f4   : > { %v1571_v19 = vadd.f32 %v3149_v53, %v1342_v13  ;;  %v1346_v20 = vadd.f32 %v1345_v18, %v1192_v17  ;;  %v1347_v22 = vpop.f32.mrb[35].mxu0 }
 0x1f5   : > { %v1572_v23 = vadd.f32 %v3151_v56, %v1344_v16  ;;  %v1348_v24 = vadd.f32 %v1347_v22, %v1194_v21 }
 0x1f6   : > { %v1573_v25 = vadd.f32 %v3149_v53, %v1346_v20 }
 0x1f7   : > { %v2087_v26 = vpack.c.bf16 %v1572_v23, %v1571_v19  ;;  %v1574_v27 = vadd.f32 %v3151_v56, %v1348_v24 }
 0x1f8   : > { %v1198_v29 = vpop.f32.mrb[36].mxu1 }
 0x1f9   : > { %1747 = vst [vmem:[%s3159_s10 + $0x80] sm:$0xff] %v2087_v26  ;;  %v2088_v28 = vpack.c.bf16 %v1574_v27, %v1573_v25  ;;  %v1351_v30 = vpop.f32.mrb[36].mxu0  ;;  %v1200_v32 = vpop.f32.mrb[37].mxu1 }
 0x1fa   : > { %v1352_v31 = vadd.f32 %v1351_v30, %v1198_v29  ;;  %v1353_v33 = vpop.f32.mrb[37].mxu0  ;;  %v1202_v35 = vpop.f32.mrb[38].mxu1 }
 0x1fb   : > { %1748 = vst [vmem:[%s3159_s10 + $0x88] sm:$0xff] %v2088_v28  ;;  %v1354_v34 = vadd.f32 %v1353_v33, %v1200_v32  ;;  %v1355_v36 = vpop.f32.mrb[38].mxu0  ;;  %v1204_v39 = vpop.f32.mrb[39].mxu1 }
 0x1fc   : > { %v1575_v37 = vadd.f32 %v3149_v53, %v1352_v31  ;;  %v1356_v38 = vadd.f32 %v1355_v36, %v1202_v35  ;;  %v1357_v40 = vpop.f32.mrb[39].mxu0 }
 0x1fd   : > { %v1576_v41 = vadd.f32 %v3151_v56, %v1354_v34  ;;  %v1358_v42 = vadd.f32 %v1357_v40, %v1204_v39 }
 0x1fe   : > { %v1577_v43 = vadd.f32 %v3149_v53, %v1356_v38 }
 0x1ff   : > { %v2089_v44 = vpack.c.bf16 %v1576_v41, %v1575_v37  ;;  %v1578_v45 = vadd.f32 %v3151_v56, %v1358_v42 }
 0x200   : > { %v1208_v47 = vpop.f32.mrb[40].mxu1 }
 0x201   : > { %1749 = vst [vmem:[%s3159_s10 + $0x90] sm:$0xff] %v2089_v44  ;;  %v2090_v46 = vpack.c.bf16 %v1578_v45, %v1577_v43  ;;  %v1361_v48 = vpop.f32.mrb[40].mxu0  ;;  %v1210_v50 = vpop.f32.mrb[41].mxu1 }
 0x202   : > { %v1362_v49 = vadd.f32 %v1361_v48, %v1208_v47  ;;  %v1363_v51 = vpop.f32.mrb[41].mxu0  ;;  %v1212_v54 = vpop.f32.mrb[42].mxu1 }
 0x203   : > { %1750 = vst [vmem:[%s3159_s10 + $0x98] sm:$0xff] %v2090_v46  ;;  %v1364_v52 = vadd.f32 %v1363_v51, %v1210_v50  ;;  %v1365_v55 = vpop.f32.mrb[42].mxu0  ;;  %v1214_v59 = vpop.f32.mrb[43].mxu1 }
 0x204   : > { %v1579_v57 = vadd.f32 %v3149_v53, %v1362_v49  ;;  %v1366_v58 = vadd.f32 %v1365_v55, %v1212_v54  ;;  %v1367_v60 = vpop.f32.mrb[43].mxu0 }
 0x205   : > { %v1580_v61 = vadd.f32 %v3151_v56, %v1364_v52  ;;  %v1368_v62 = vadd.f32 %v1367_v60, %v1214_v59 }
 0x206   : > { %v1581_v63 = vadd.f32 %v3149_v53, %v1366_v58 }
 0x207   : > { %v2091_v0 = vpack.c.bf16 %v1580_v61, %v1579_v57  ;;  %v1582_v1 = vadd.f32 %v3151_v56, %v1368_v62 }
 0x208   : > { %v1218_v3 = vpop.f32.mrb[44].mxu1 }
 0x209   : > { %1751 = vst [vmem:[%s3159_s10 + $0xa0] sm:$0xff] %v2091_v0  ;;  %v2092_v2 = vpack.c.bf16 %v1582_v1, %v1581_v63  ;;  %v1371_v4 = vpop.f32.mrb[44].mxu0  ;;  %v1220_v6 = vpop.f32.mrb[45].mxu1 }
 0x20a   : > { %v1372_v5 = vadd.f32 %v1371_v4, %v1218_v3  ;;  %v1373_v7 = vpop.f32.mrb[45].mxu0  ;;  %v1222_v9 = vpop.f32.mrb[46].mxu1 }
 0x20b   : > { %1752 = vst [vmem:[%s3159_s10 + $0xa8] sm:$0xff] %v2092_v2  ;;  %v1374_v8 = vadd.f32 %v1373_v7, %v1220_v6  ;;  %v1375_v10 = vpop.f32.mrb[46].mxu0  ;;  %v1224_v13 = vpop.f32.mrb[47].mxu1 }
 0x20c   : > { %v1583_v11 = vadd.f32 %v3149_v53, %v1372_v5  ;;  %v1376_v12 = vadd.f32 %v1375_v10, %v1222_v9  ;;  %v1377_v14 = vpop.f32.mrb[47].mxu0 }
 0x20d   : > { %v1584_v15 = vadd.f32 %v3151_v56, %v1374_v8  ;;  %v1378_v16 = vadd.f32 %v1377_v14, %v1224_v13 }
 0x20e   : > { %v1585_v17 = vadd.f32 %v3149_v53, %v1376_v12 }
 0x20f   : > { %v2093_v18 = vpack.c.bf16 %v1584_v15, %v1583_v11  ;;  %v1586_v19 = vadd.f32 %v3151_v56, %v1378_v16 }
 0x211   : > { %1753 = vst [vmem:[%s3159_s10 + $0xb0] sm:$0xff] %v2093_v18  ;;  %v2094_v20 = vpack.c.bf16 %v1586_v19, %v1585_v17 }
 0x213   : > { %1754 = vst [vmem:[%s3159_s10 + $0xb8] sm:$0xff] %v2094_v20 }
 0x214   : > { %2563 = shalt.err (!%p2560_p1)
}
 0x215   : > { %s2564_s27 = scalar_lea.hbm %s3233_s0, 3072  ;;  %s2568_s10 = scalar_lea.hbm %s3373_s11, 24576 }
 0x216   : > { %p2565_p0 = scmp.ne.s32.totalorder %s3233_s0, %s2564_s27  ;;  %p2569_p8 = scmp.lt.u32.totalorder %s3233_s0, %s3373_s11 }
 0x217   : > { %p2570_p5 = scmp.lt.u32.totalorder %s2568_s10, %s2564_s27  ;;  %p2572_p13 = scmp.lt.u32.totalorder %s2564_s27, %s3233_s0 }
 0x218   : > { %p2566_p3 = pnand %p2565_p0, %p3374_p12 }
 0x219   : > { %p2571_p6 = por %p2570_p5, %p2569_p8 }
 0x21a   : > { %p2567_p7 = pneg %p2566_p3 }
 0x21b   : > { %p2573_p11 = por %p2572_p13, %p2571_p6 }
 0x21d   : > { %p2574_p10 = pnand %p2573_p11, %p2567_p7 }
 0x21f   : > { %2577 = shalt.err (!%p2574_p10)
}
 0x220   : > { %s2711_s1 = smov 128   ;;  %s2712_s21 = smov 512  }
 0x221   : > { %s2713_s18 = smov 8  }
 0x222   : > { %2154 = dma.vmem_to_hbm [thread:$0]  (%p3374_p12), %s3235_s7, 3072, %s3233_s0, %s3241_s30, %s2711_s1, %s2712_s21, %s2713_s18  }
 0x223 PF: > { %p2171_p2 = scmp.ge.s32.totalorder %s2700_s25, 2  ;;  %s1787_s28 = sand.u32 1, %s2648_s12  }
 0x224   : > { %p3375_p9 = scmp.ne.s32.totalorder %s3360_s5, 0  ;;  %s1788_s6 = scalar_lea.sflag [#allocation5], %s1787_s28 }
 0x226   : > { %p2167_p4 = pnand %p2171_p2, %p3375_p9 }
 0x228   : > { %2643 = dma.done.wait (!%p2167_p4), %s1788_s6, 3072  }
 0x229   : > { %2645 = vsyncadd (!%p2167_p4), %s1788_s6, 4294964224  ;;  %s22_s25 = sadd.s32 1, %s2700_s25   ;;  %s3377_s15 = sld [smem:[#allocation22_spill]] }
 0x22a   : > { %p3270_p1 = scmp.ge.s32.totalorder %s22_s25, 10   ;;  %s3378_s7 = sld [smem:[#allocation20_spill]] }
 0x22b   : > { %s3379_s0 = sld [smem:[#allocation13_spill]]  ;;  %s3380_s30 = sld [smem:[#allocation21_spill]] }
 0x22c   : > { %s3381_s22 = sld [smem:[#allocation16_spill]]  ;;  %s3382_s5 = sld [smem:[#allocation17_spill]] }
 0x22d   : > { %s3383_s24 = sld [smem:[#allocation18_spill]]  ;;  %s3385_s12 = smov %s2652_s13 }
 0x22e   : > { %s3386_s13 = smov %s2656_s14  ;;  %s3391_s18 = smov %s2676_s19 }
 0x22f   : > { %s3387_s14 = smov %s3377_s15  ;;  %s3388_s15 = smov %s2664_s16 }
 0x230   : > { %s3389_s16 = smov %s2668_s17  ;;  %s3390_s17 = smov %s3378_s7 }
 0x231   : > { %s3392_s19 = smov %s3379_s0  ;;  %s3393_s20 = smov %s3380_s30 }
 0x232   : > { %s3394_s21 = smov %s2692_s23  ;;  %s3395_s23 = smov %s3382_s5 }
 0x233   :  { %21 = sbr.rel (!%p3270_p1) target bundleno = 16 (0x10), region = 109 }
 0x23a   :  { %1793 = vsyncpa [#allocation4], 1 }
 0x23b   :  { %1795 = vsyncpa [#allocation4 + $0x1], 1 }
 0x23c   :  { %1796 = vsyncpa [#allocation7], 1 }
 0x23d   :  { %1798 = vsyncpa [#allocation7 + $0x1], 1 }
 0x23e   :  { %1799 = vsyncpa [#allocation5], 1 }
 0x23f   :  { %1801 = vsyncpa [#allocation5 + $0x1], 1 }

</bundles_post_ra>
